<compile_context>
chip_gen: v5e
topology: v5e:2x2
jax: 0.10.0
libtpu: 0.0.40
codegen_flags: <defaults>
</compile_context>

<pallas_src>
import jax
import jax.numpy as jnp
from jax.experimental import pallas as pl
from jax.experimental.pallas import tpu as pltpu

FEAT = 512        # CLIP feature dim per modality
H1 = 512          # hidden 1
H2 = 256          # hidden 2
OUT = 1           # similarity logit
LANE = 128        # lane width (padded layer-3 output on the MXU path)

TB_MAX = 2048     # batch tile upper bound (multiple of 256 / 128 MXU widths)


def _round_up(x, m):
    return ((x + m - 1) // m) * m


def _choose_tile(B):
    """Pick (TB, Bp): batch tile and padded batch length (Bp % TB == 0)."""
    if B < 256:
        # Tiny batch: one tile, rounded to bf16 sublane packing (16 rows, not 8).
        tb = _round_up(B, 16)
        return tb, tb
    b128 = _round_up(B, 128)
    # Largest 128-multiple tile that still yields >= 2 tiles (v7x megacore shards
    # the ("parallel",) batch axis across its 2 TensorCores only if grid > 1).
    tb = max(128, (b128 // 2) // 128 * 128)
    tb = min(tb, TB_MAX)
    return tb, _round_up(B, tb)


def _detect_mxu_finale():
    """Lane-dense MXU layer-3 on v5e/v5p/v7x; VPU+reduce on v6e / unknown."""
    try:
        kind = jax.devices()[0].device_kind.lower()
    except Exception:
        return False
    return ("v5" in kind) or ("v7" in kind)


_USE_MXU_L3 = _detect_mxu_finale()


def _mlp_trunk(img_ref, txt_ref, w1a_ref, w1b_ref, b1_ref, w2_ref, b2_ref):
    """Layers 1-2 on one batch tile: returns (TB, 256) f32 post-ReLU activations."""
    # In-kernel bf16 cast: hides under the MXU, avoids a standalone XLA astype pass.
    img = img_ref[...].astype(jnp.bfloat16)                # (TB, 512)
    txt = txt_ref[...].astype(jnp.bfloat16)                # (TB, 512)

    # Layer 1: Linear(1024 -> 512) folded as img@W1[:512] + txt@W1[512:], + ReLU.
    # TODO(synk): on v5e a single K=1024 dot via a (TB,1024) scratch saves one MRF
    #             drain; the two-dot form is already fine on v6e/v7x (low priority).
    h1 = jnp.dot(img, w1a_ref[...], preferred_element_type=jnp.float32)
    h1 = h1 + jnp.dot(txt, w1b_ref[...], preferred_element_type=jnp.float32)
    h1 = jnp.maximum(h1 + b1_ref[...], 0.0)                # (TB, 512) f32

    # Dropout(0.2) is the identity at inference.
    # Layer 2: Linear(512 -> 256) + ReLU.
    h2 = jnp.dot(h1.astype(jnp.bfloat16), w2_ref[...],
                 preferred_element_type=jnp.float32)
    return jnp.maximum(h2 + b2_ref[...], 0.0)              # (TB, 256) f32


def _kernel_vpu_finale(img_ref, txt_ref, w1a_ref, w1b_ref, b1_ref,
                       w2_ref, b2_ref, w3_ref, b3_ref, out_ref):
    """v6e path: layer 3 as VPU multiply + lane reduce, (TB, 1) output."""
    h2 = _mlp_trunk(img_ref, txt_ref, w1a_ref, w1b_ref, b1_ref, w2_ref, b2_ref)
    y = jnp.sum(h2 * w3_ref[...], axis=-1, keepdims=True) + b3_ref[...]
    out_ref[...] = y.astype(out_ref.dtype)                 # (TB, 1) f32


def _kernel_mxu_finale(img_ref, txt_ref, w1a_ref, w1b_ref, b1_ref,
                       w2_ref, b2_ref, w3p_ref, b3p_ref, out_ref):
    """v5e/v7x path: layer 3 as an N=128 MXU matmul -> lane-dense (TB, 128) output."""
    h2 = _mlp_trunk(img_ref, txt_ref, w1a_ref, w1b_ref, b1_ref, w2_ref, b2_ref)
    y = jnp.dot(h2.astype(jnp.bfloat16), w3p_ref[...],
                preferred_element_type=jnp.float32)
    out_ref[...] = (y + b3p_ref[...]).astype(out_ref.dtype)   # (TB, 128) f32


def prepare_params(params):
    """One-time param prep: split W1 for the folded concat, cast frozen weights to
    bf16 for the MXU, keep biases in f32. Provides both layer-3 forms (VPU row /
    MXU lane-padded)."""
    w1 = params["w1"]                                       # (1024, 512)
    w3 = params["w3"]                                       # (256, 1)
    w3_pad = jnp.zeros((H2, LANE), jnp.float32).at[:, :OUT].set(w3)
    b3_pad = jnp.zeros((1, LANE), jnp.float32).at[:, :OUT].set(
        params["b3"].reshape(1, OUT))
    return {
        "w1a": w1[:FEAT, :].astype(jnp.bfloat16),           # (512, 512)
        "w1b": w1[FEAT:, :].astype(jnp.bfloat16),           # (512, 512)
        "b1": params["b1"].reshape(1, H1).astype(jnp.float32),
        "w2": params["w2"].astype(jnp.bfloat16),            # (512, 256)
        "b2": params["b2"].reshape(1, H2).astype(jnp.float32),
        "w3_row": w3.reshape(1, H2).astype(jnp.float32),    # VPU path
        "b3": params["b3"].reshape(1, OUT).astype(jnp.float32),
        "w3_pad": w3_pad.astype(jnp.bfloat16),              # MXU path (256, 128)
        "b3_pad": b3_pad,                                    # (1, 128)
    }


@jax.jit
def disdrive_classifier_forward(image_features, text_features, prepared):
    """Pallas-backed forward of DisDriveClassifier's classifier head.

    image_features, text_features: (B, 512) float32 (frozen CLIP encoder outputs).
    prepared: output of prepare_params().
    Returns (B, 1) float32 similarity logits.
    """
    B = image_features.shape[0]
    TB, Bp = _choose_tile(B)

    img, txt = image_features, text_features
    if Bp != B:   # pad only when the batch isn't tile-aligned (tiny / ragged B)
        pad = ((0, Bp - B), (0, 0))
        img = jnp.pad(img, pad)
        txt = jnp.pad(txt, pad)

    feat_spec = pl.BlockSpec((TB, FEAT), lambda i: (i, 0))
    # Constant index_map + single buffer: weights/biases stay resident in VMEM
    # across batch tiles with no dead second buffer.
    resident = lambda shape: pl.BlockSpec(shape, lambda i: (0, 0),
                                          pipeline_mode=pl.Buffered(1))

    use_mxu_l3 = _USE_MXU_L3
    kernel = _kernel_mxu_finale if use_mxu_l3 else _kernel_vpu_finale
    out_cols = LANE if use_mxu_l3 else OUT
    w3 = prepared["w3_pad"] if use_mxu_l3 else prepared["w3_row"]
    b3 = prepared["b3_pad"] if use_mxu_l3 else prepared["b3"]

    weight_bytes = ((2 * FEAT * H1 + H1 * H2) * 2 + (H1 + H2) * 4
                    + w3.size * w3.dtype.itemsize + b3.size * 4)
    cost = pl.CostEstimate(
        flops=2 * Bp * (2 * FEAT * H1 + H1 * H2 + H2 * out_cols),
        transcendentals=0,
        bytes_accessed=Bp * 2 * FEAT * 4 + Bp * out_cols * 4 + weight_bytes,
    )

    out = pl.pallas_call(
        kernel,
        out_shape=jax.ShapeDtypeStruct((Bp, out_cols), jnp.float32),
        grid=(Bp // TB,),
        in_specs=[
            feat_spec,                              # image features  (TB, 512) f32
            feat_spec,                              # text features   (TB, 512) f32
            resident((FEAT, H1)),                   # W1[:512]   bf16
            resident((FEAT, H1)),                   # W1[512:]   bf16
            resident((1, H1)),                      # b1         f32
            resident((H1, H2)),                     # W2         bf16
            resident((1, H2)),                      # b2         f32
            resident(tuple(w3.shape)),              # W3 (row or lane-padded)
            resident(tuple(b3.shape)),              # b3
        ],
        out_specs=pl.BlockSpec((TB, out_cols), lambda i: (i, 0)),
        compiler_params=pltpu.CompilerParams(
            dimension_semantics=("parallel",),      # shard batch tiles over 2 TCs (v7x)
            vmem_limit_bytes=48 << 20,              # TB=2048 buffers overflow v5e's 16 MiB default
        ),
        cost_estimate=cost,
    )(img, txt,
      prepared["w1a"], prepared["w1b"], prepared["b1"],
      prepared["w2"], prepared["b2"],
      w3, b3)

    return out[:B, :OUT]


def init_params(key):
    """Deterministic init matching nn.Linear shapes (stored as (in, out) = torch W.T)."""
    ks = jax.random.split(key, 6)

    def lin(kw, kb, fan_in, fan_out):
        bound = 1.0 / jnp.sqrt(fan_in)
        w = jax.random.uniform(kw, (fan_in, fan_out), jnp.float32, -bound, bound)
        b = jax.random.uniform(kb, (fan_out,), jnp.float32, -bound, bound)
        return w, b

    w1, b1 = lin(ks[0], ks[1], 2 * FEAT, H1)
    w2, b2 = lin(ks[2], ks[3], H1, H2)
    w3, b3 = lin(ks[4], ks[5], H2, OUT)
    return {"w1": w1, "b1": b1, "w2": w2, "b2": b2, "w3": w3, "b3": b3}


def reference_forward(image_features, text_features, params):
    """Plain-JAX f32 reference matching the PyTorch forward (eval mode)."""
    combined = jnp.concatenate([image_features, text_features], axis=1)
    h1 = jnp.maximum(combined @ params["w1"] + params["b1"], 0.0)
    h2 = jnp.maximum(h1 @ params["w2"] + params["b2"], 0.0)
    return h2 @ params["w3"] + params["b3"]


if __name__ == "__main__":
    key = jax.random.PRNGKey(0)
    k_img, k_txt, k_par = jax.random.split(key, 3)

    B = 2  # small batch
    # Stand-ins for frozen CLIP encoder outputs (B, 512) each.
    image_features = jax.random.normal(k_img, (B, FEAT), dtype=jnp.float32)
    text_features = jax.random.normal(k_txt, (B, FEAT), dtype=jnp.float32)

    params = init_params(k_par)
    prepared = prepare_params(params)

    out = disdrive_classifier_forward(image_features, text_features, prepared)
    out = jax.block_until_ready(out)

    ref = reference_forward(image_features, text_features, params)
    assert out.shape == (B, OUT), out.shape
    # bf16 matmul operands vs f32 reference -> loosened tolerance.
    assert jnp.allclose(out, ref, atol=5e-2, rtol=5e-2), (out, ref)

    print("KERNEL_OK")
</pallas_src>

<mosaic_0001>
module attributes {stable_mosaic.version = 11 : i64} {
  func.func @_kernel_vpu_finale(%arg0: i32, %arg1: memref<16x512xf32, #tpu.memory_space<vmem>>, %arg2: memref<16x512xf32, #tpu.memory_space<vmem>>, %arg3: memref<512x512xbf16, #tpu.memory_space<vmem>>, %arg4: memref<512x512xbf16, #tpu.memory_space<vmem>>, %arg5: memref<1x512xf32, #tpu.memory_space<vmem>>, %arg6: memref<512x256xbf16, #tpu.memory_space<vmem>>, %arg7: memref<1x256xf32, #tpu.memory_space<vmem>>, %arg8: memref<1x256xf32, #tpu.memory_space<vmem>>, %arg9: memref<1x1xf32, #tpu.memory_space<vmem>>, %arg10: memref<16x1xf32, #tpu.memory_space<vmem>>) attributes {dimension_semantics = [#tpu.dimension_semantics<parallel>], iteration_bounds = array<i64: 1>, scalar_prefetch = 0 : i64, scratch_operands = 0 : i64, tpu.core_type = #tpu.core_type<tc>, window_params = [{transform_indices = @transform_0, window_bounds = array<i64: 16, 512>}, {transform_indices = @transform_1, window_bounds = array<i64: 16, 512>}, {pipeline_mode = #tpu.pipeline_mode<synchronous>, transform_indices = @transform_2, window_bounds = array<i64: 512, 512>}, {pipeline_mode = #tpu.pipeline_mode<synchronous>, transform_indices = @transform_3, window_bounds = array<i64: 512, 512>}, {pipeline_mode = #tpu.pipeline_mode<synchronous>, transform_indices = @transform_4, window_bounds = array<i64: 1, 512>}, {pipeline_mode = #tpu.pipeline_mode<synchronous>, transform_indices = @transform_5, window_bounds = array<i64: 512, 256>}, {pipeline_mode = #tpu.pipeline_mode<synchronous>, transform_indices = @transform_6, window_bounds = array<i64: 1, 256>}, {pipeline_mode = #tpu.pipeline_mode<synchronous>, transform_indices = @transform_7, window_bounds = array<i64: 1, 256>}, {pipeline_mode = #tpu.pipeline_mode<synchronous>, transform_indices = @transform_8, window_bounds = array<i64: 1, 1>}, {transform_indices = @transform_9, window_bounds = array<i64: 16, 1>}]} {
    %c0 = arith.constant 0 : index
    %c0_0 = arith.constant 0 : index
    %0 = vector.load %arg1[%c0, %c0_0] : memref<16x512xf32, #tpu.memory_space<vmem>>, vector<16x512xf32>
    %1 = arith.truncf %0 : vector<16x512xf32> to vector<16x512xbf16>
    %c0_1 = arith.constant 0 : index
    %c0_2 = arith.constant 0 : index
    %2 = vector.load %arg2[%c0_1, %c0_2] : memref<16x512xf32, #tpu.memory_space<vmem>>, vector<16x512xf32>
    %3 = arith.truncf %2 : vector<16x512xf32> to vector<16x512xbf16>
    %c0_3 = arith.constant 0 : index
    %c0_4 = arith.constant 0 : index
    %4 = vector.load %arg3[%c0_3, %c0_4] : memref<512x512xbf16, #tpu.memory_space<vmem>>, vector<512x512xbf16>
    %cst = arith.constant dense<0.000000e+00> : vector<16x512xf32>
    %5 = tpu.matmul %1, %4, %cst {dimension_numbers = #tpu.dot_dimension_numbers<[1], [0], [0], [1], [0, 0, 1, 1], [], []>} : vector<16x512xbf16>, vector<512x512xbf16>, vector<16x512xf32> -> vector<16x512xf32>
    %c0_5 = arith.constant 0 : index
    %c0_6 = arith.constant 0 : index
    %6 = vector.load %arg4[%c0_5, %c0_6] : memref<512x512xbf16, #tpu.memory_space<vmem>>, vector<512x512xbf16>
    %cst_7 = arith.constant dense<0.000000e+00> : vector<16x512xf32>
    %7 = tpu.matmul %3, %6, %cst_7 {dimension_numbers = #tpu.dot_dimension_numbers<[1], [0], [0], [1], [0, 0, 1, 1], [], []>} : vector<16x512xbf16>, vector<512x512xbf16>, vector<16x512xf32> -> vector<16x512xf32>
    %8 = arith.addf %5, %7 : vector<16x512xf32>
    %c0_8 = arith.constant 0 : index
    %c0_9 = arith.constant 0 : index
    %9 = vector.load %arg5[%c0_8, %c0_9] : memref<1x512xf32, #tpu.memory_space<vmem>>, vector<1x512xf32>
    %10 = vector.broadcast %9 : vector<1x512xf32> to vector<16x512xf32>
    %11 = arith.addf %8, %10 : vector<16x512xf32>
    %cst_10 = arith.constant 0.000000e+00 : f32
    %12 = vector.broadcast %cst_10 : f32 to vector<16x512xf32>
    %13 = arith.maximumf %11, %12 : vector<16x512xf32>
    %14 = arith.truncf %13 : vector<16x512xf32> to vector<16x512xbf16>
    %c0_11 = arith.constant 0 : index
    %c0_12 = arith.constant 0 : index
    %15 = vector.load %arg6[%c0_11, %c0_12] : memref<512x256xbf16, #tpu.memory_space<vmem>>, vector<512x256xbf16>
    %cst_13 = arith.constant dense<0.000000e+00> : vector<16x256xf32>
    %16 = tpu.matmul %14, %15, %cst_13 {dimension_numbers = #tpu.dot_dimension_numbers<[1], [0], [0], [1], [0, 0, 1, 1], [], []>} : vector<16x512xbf16>, vector<512x256xbf16>, vector<16x256xf32> -> vector<16x256xf32>
    %c0_14 = arith.constant 0 : index
    %c0_15 = arith.constant 0 : index
    %17 = vector.load %arg7[%c0_14, %c0_15] : memref<1x256xf32, #tpu.memory_space<vmem>>, vector<1x256xf32>
    %18 = vector.broadcast %17 : vector<1x256xf32> to vector<16x256xf32>
    %19 = arith.addf %16, %18 : vector<16x256xf32>
    %cst_16 = arith.constant 0.000000e+00 : f32
    %20 = vector.broadcast %cst_16 : f32 to vector<16x256xf32>
    %21 = arith.maximumf %19, %20 : vector<16x256xf32>
    %c0_17 = arith.constant 0 : index
    %c0_18 = arith.constant 0 : index
    %22 = vector.load %arg8[%c0_17, %c0_18] : memref<1x256xf32, #tpu.memory_space<vmem>>, vector<1x256xf32>
    %23 = vector.broadcast %22 : vector<1x256xf32> to vector<16x256xf32>
    %24 = arith.mulf %21, %23 : vector<16x256xf32>
    %cst_19 = arith.constant dense<0.000000e+00> : vector<16xf32>
    %25 = vector.multi_reduction <add>, %24, %cst_19 [1] : vector<16x256xf32> to vector<16xf32>
    %26 = vector.shape_cast %25 : vector<16xf32> to vector<16x1xf32>
    %c0_20 = arith.constant 0 : index
    %c0_21 = arith.constant 0 : index
    %27 = vector.load %arg9[%c0_20, %c0_21] : memref<1x1xf32, #tpu.memory_space<vmem>>, vector<1x1xf32>
    %28 = vector.broadcast %27 : vector<1x1xf32> to vector<16x1xf32>
    %29 = arith.addf %26, %28 : vector<16x1xf32>
    %c0_22 = arith.constant 0 : index
    %c0_23 = arith.constant 0 : index
    %30 = vector.load %arg10[%c0_22, %c0_23] : memref<16x1xf32, #tpu.memory_space<vmem>>, vector<16x1xf32>
    tpu.vector_store %arg10[%c0_22, %c0_23], %29 {strides = array<i32>} : memref<16x1xf32, #tpu.memory_space<vmem>>, vector<16x1xf32>,
    return
  }
  func.func @transform_0(%arg0: i32) -> (i32, i32) {
    %c0_i32 = arith.constant 0 : i32
    %c0_i32_0 = arith.constant 0 : i32
    return %arg0, %c0_i32 : i32, i32
  }
  func.func @transform_1(%arg0: i32) -> (i32, i32) {
    %c0_i32 = arith.constant 0 : i32
    %c0_i32_0 = arith.constant 0 : i32
    return %arg0, %c0_i32 : i32, i32
  }
  func.func @transform_2(%arg0: i32) -> (i32, i32) {
    %c0_i32 = arith.constant 0 : i32
    %c0_i32_0 = arith.constant 0 : i32
    %c0_i32_1 = arith.constant 0 : i32
    return %c0_i32, %c0_i32_0 : i32, i32
  }
  func.func @transform_3(%arg0: i32) -> (i32, i32) {
    %c0_i32 = arith.constant 0 : i32
    %c0_i32_0 = arith.constant 0 : i32
    %c0_i32_1 = arith.constant 0 : i32
    return %c0_i32, %c0_i32_0 : i32, i32
  }
  func.func @transform_4(%arg0: i32) -> (i32, i32) {
    %c0_i32 = arith.constant 0 : i32
    %c0_i32_0 = arith.constant 0 : i32
    %c0_i32_1 = arith.constant 0 : i32
    return %c0_i32, %c0_i32_0 : i32, i32
  }
  func.func @transform_5(%arg0: i32) -> (i32, i32) {
    %c0_i32 = arith.constant 0 : i32
    %c0_i32_0 = arith.constant 0 : i32
    %c0_i32_1 = arith.constant 0 : i32
    return %c0_i32, %c0_i32_0 : i32, i32
  }
  func.func @transform_6(%arg0: i32) -> (i32, i32) {
    %c0_i32 = arith.constant 0 : i32
    %c0_i32_0 = arith.constant 0 : i32
    %c0_i32_1 = arith.constant 0 : i32
    return %c0_i32, %c0_i32_0 : i32, i32
  }
  func.func @transform_7(%arg0: i32) -> (i32, i32) {
    %c0_i32 = arith.constant 0 : i32
    %c0_i32_0 = arith.constant 0 : i32
    %c0_i32_1 = arith.constant 0 : i32
    return %c0_i32, %c0_i32_0 : i32, i32
  }
  func.func @transform_8(%arg0: i32) -> (i32, i32) {
    %c0_i32 = arith.constant 0 : i32
    %c0_i32_0 = arith.constant 0 : i32
    %c0_i32_1 = arith.constant 0 : i32
    return %c0_i32, %c0_i32_0 : i32, i32
  }
  func.func @transform_9(%arg0: i32) -> (i32, i32) {
    %c0_i32 = arith.constant 0 : i32
    %c0_i32_0 = arith.constant 0 : i32
    return %arg0, %c0_i32 : i32, i32
  }
}

</mosaic_0001>

<bundles_post_ra>
// kernel: disdrive_classifier_forward.1
= control target key start
LH: loop header
LB: loop body
LE: loop exit
PB: predicated region body
PF: predicated region fallthrough
CT: control target
= control target key end

     0   :  { %s4559_s0 = inlined_call_operand.vmem [shape: f32[16,512], index: 0, kind: input, shape index: {}]   ;;  %s4560_s1 = inlined_call_operand.vmem [shape: f32[16,512], index: 1, kind: input, shape index: {}]   ;;  %s4561_s2 = inlined_call_operand.hbm [shape: bf16[512,512], index: 2, kind: input, shape index: {}]   ;;  %s4562_s3 = inlined_call_operand.hbm [shape: bf16[512,512], index: 3, kind: input, shape index: {}]   ;;  %s4563_s4 = inlined_call_operand.vmem [shape: f32[1,512], index: 4, kind: input, shape index: {}]   ;;  %s4564_s5 = inlined_call_operand.hbm [shape: bf16[512,256], index: 5, kind: input, shape index: {}]   ;;  %s4565_s6 = inlined_call_operand.vmem [shape: f32[1,256], index: 6, kind: input, shape index: {}]   ;;  %s4566_s7 = inlined_call_operand.vmem [shape: f32[1,256], index: 7, kind: input, shape index: {}]   ;;  %s4567_s8 = inlined_call_operand.<no memory space> [shape: f32[1,1], index: 8, kind: input, shape index: {}]   ;;  %s4568_s9 = inlined_call_operand.vmem [shape: f32[16,1], index: 9, kind: output, shape index: {}]  }
   0x1   :  { %v14_v0 = vstv %s4567_s8 }
   0x2   :  { %15 = vst [vmem:[#allocation2] sm:$0x1] %v14_v0 }
   0x3   :  { %16 = vsyncpa [#allocation4], 0 }
   0x4   :  { %17 = vsyncpa [#allocation6], 0  ;;  %s39_s13 = sshll.u32 %s4562_s3, 4  ;;  %s4340_s14 = smov [#allocation5]   ;;  %s40_s13 = int_to_ptr.hbm [resolvable:$true] %s39_s13 }
   0x5   :  { %s41_s15 = sshll.u32 %s4340_s14, 4  ;;  %s26_s18 = sshll.u32 %s4561_s2, 4  ;;  %s42_s15 = int_to_ptr.vmem [resolvable:$true] %s41_s15  ;;  %s27_s18 = int_to_ptr.hbm [resolvable:$true] %s26_s18 }
   0x6   :  { %s4341_s19 = smov 256   ;;  %s4342_s20 = smov 16  }
   0x7   :  { %47 = dma.hbm_to_vmem [thread:$0]  %s40_s13, 16384, %s42_s15, [#allocation6], %s4341_s19, %s4341_s19, %s4342_s20  }
   0x8   :  { %s4343_s8 = smov [#allocation3]   ;;  %s54_s24 = sshll.u32 %s4564_s5, 4  ;;  %s55_s24 = int_to_ptr.hbm [resolvable:$true] %s54_s24 }
   0x9   :  { %s28_s21 = sshll.u32 %s4343_s8, 4  ;;  %s4344_s3 = smov [#allocation7]   ;;  %s29_s21 = int_to_ptr.vmem [resolvable:$true] %s28_s21 }
   0xa   :  { %34 = dma.hbm_to_vmem [thread:$0]  %s27_s18, 16384, %s29_s21, [#allocation4], %s4341_s19, %s4341_s19, %s4342_s20  }
   0xb   :  { %s56_s25 = sshll.u32 %s4344_s3, 4  ;;  %s4345_s26 = smov 128   ;;  %s57_s25 = int_to_ptr.vmem [resolvable:$true] %s56_s25 }
   0xc   :  { %s4346_s27 = smov 8  }
   0xd   :  { %62 = dma.hbm_to_vmem [thread:$0]  %s55_s24, 8192, %s57_s25, [#allocation6], %s4345_s26, %s4345_s26, %s4346_s27  }
   0xe   :  { %4336 = dma.done.wait [#allocation4], 16384  }
   0xf   :  { %4337 = vsyncadd [#allocation4], 4294950912 }
  0x10   :  { %4338 = dma.done.wait [#allocation6], 24576  }
  0x11   :  { %4339 = vsyncadd [#allocation6], 4294942720  ;;  %v2770_v1 = vld [vmem:[#allocation5 + $0xe0] sm:$0xf]  ;;  %v4094_v2 = vld [vmem:[#allocation5 + $0xec] sm:$0xf0] }
  0x12   :  { %v2898_v3 = vld [vmem:[#allocation5 + $0x1e0] sm:$0xf]  ;;  %v2771_v4 = vor.u32 %v4094_v2, %v2770_v1  ;;  %v4126_v5 = vld [vmem:[#allocation5 + $0x1ec] sm:$0xf0]  ;;  %vm2647_vm0 = vcmask 7168  }
  0x13   :  { %v3026_v6 = vld [vmem:[#allocation5 + $0x2e0] sm:$0xf]  ;;  %v4158_v7 = vld [vmem:[#allocation5 + $0x2ec] sm:$0xf0]  ;;  %v2899_v8 = vor.u32 %v4126_v5, %v2898_v3 }
  0x14   :  { %v3027_v9 = vor.u32 %v4158_v7, %v3026_v6  ;;  %v3154_v10 = vld [vmem:[#allocation5 + $0x3e0] sm:$0xf]  ;;  %v4190_v11 = vld [vmem:[#allocation5 + $0x3ec] sm:$0xf0]  ;;  %1001 = vmatpush.bf16.msra.mxu0 %v2771_v4 }
  0x15   :  { %v2754_v12 = vld [vmem:[#allocation5 + $0xc0] sm:$0xf]  ;;  %v3155_v13 = vor.u32 %v4190_v11, %v3154_v10  ;;  %v4090_v14 = vld [vmem:[#allocation5 + $0xcc] sm:$0xf0]  ;;  %1015 = vmatpush.bf16.msra.mxu1 %v2899_v8 }
  0x16   :  { %v2882_v15 = vld [vmem:[#allocation5 + $0x1c0] sm:$0xf]  ;;  %v4122_v16 = vld [vmem:[#allocation5 + $0x1cc] sm:$0xf0]  ;;  %1029 = vmatpush.bf16.msra.mxu2 %v3027_v9  ;;  %v2755_v17 = vor.u32 %v4090_v14, %v2754_v12 }
  0x17   :  { %v2883_v18 = vor.u32 %v4122_v16, %v2882_v15  ;;  %v3010_v19 = vld [vmem:[#allocation5 + $0x2c0] sm:$0xf]  ;;  %v4154_v20 = vld [vmem:[#allocation5 + $0x2cc] sm:$0xf0]  ;;  %1043 = vmatpush.bf16.msra.mxu3 %v3155_v13 }
  0x18   :  { %v3138_v21 = vld [vmem:[#allocation5 + $0x3c0] sm:$0xf]  ;;  %v3011_v22 = vor.u32 %v4154_v20, %v3010_v19  ;;  %v4186_v23 = vld [vmem:[#allocation5 + $0x3cc] sm:$0xf0]  ;;  %1002 = vmatpush.bf16.msra.mxu0 %v2755_v17 }
  0x19   :  { %v2738_v24 = vld [vmem:[#allocation5 + $0xa0] sm:$0xf]  ;;  %v4086_v25 = vld [vmem:[#allocation5 + $0xac] sm:$0xf0]  ;;  %v3139_v26 = vor.u32 %v4186_v23, %v3138_v21  ;;  %1016 = vmatpush.bf16.msra.mxu1 %v2883_v18 }
  0x1a   :  { %v2866_v27 = vld [vmem:[#allocation5 + $0x1a0] sm:$0xf]  ;;  %v4118_v28 = vld [vmem:[#allocation5 + $0x1ac] sm:$0xf0]  ;;  %v2739_v30 = vor.u32 %v4086_v25, %v2738_v24  ;;  %1030 = vmatpush.bf16.msra.mxu2 %v3011_v22 }
  0x1b   :  { %v2994_v29 = vld [vmem:[#allocation5 + $0x2a0] sm:$0xf]  ;;  %v4150_v31 = vld [vmem:[#allocation5 + $0x2ac] sm:$0xf0]  ;;  %v2867_v34 = vor.u32 %v4118_v28, %v2866_v27  ;;  %1044 = vmatpush.bf16.msra.mxu3 %v3139_v26 }
  0x1c   :  { %v3122_v32 = vld [vmem:[#allocation5 + $0x3a0] sm:$0xf]  ;;  %v4182_v33 = vld [vmem:[#allocation5 + $0x3ac] sm:$0xf0]  ;;  %v2995_v35 = vor.u32 %v4150_v31, %v2994_v29  ;;  %1003 = vmatpush.bf16.msra.mxu0 %v2739_v30  ;;  %v4092_v29 = vld [vmem:[#allocation5 + $0xe4] sm:$0xf] }
  0x1d   :  { %v2722_v36 = vld [vmem:[#allocation5 + $0x80] sm:$0xf]  ;;  %v4082_v37 = vld [vmem:[#allocation5 + $0x8c] sm:$0xf0]  ;;  %v3123_v39 = vor.u32 %v4182_v33, %v3122_v32  ;;  %1017 = vmatpush.bf16.msra.mxu1 %v2867_v34  ;;  %v2772_v30 = vld [vmem:[#allocation5 + $0xf0] sm:$0xf0] }
  0x1e   :  { %v2850_v38 = vld [vmem:[#allocation5 + $0x180] sm:$0xf]  ;;  %v4114_v40 = vld [vmem:[#allocation5 + $0x18c] sm:$0xf0]  ;;  %v2723_v45 = vor.u32 %v4082_v37, %v2722_v36  ;;  %1031 = vmatpush.bf16.msra.mxu2 %v2995_v35  ;;  %v4124_v31 = vld [vmem:[#allocation5 + $0x1e4] sm:$0xf] }
  0x1f   :  { %v2978_v41 = vld [vmem:[#allocation5 + $0x280] sm:$0xf]  ;;  %v4146_v42 = vld [vmem:[#allocation5 + $0x28c] sm:$0xf0]  ;;  %v2851_v46 = vor.u32 %v4114_v40, %v2850_v38  ;;  %1045 = vmatpush.bf16.msra.mxu3 %v3123_v39  ;;  %v2900_v33 = vld [vmem:[#allocation5 + $0x1f0] sm:$0xf0] }
  0x20   :  { %v3106_v43 = vld [vmem:[#allocation5 + $0x380] sm:$0xf]  ;;  %v4178_v44 = vld [vmem:[#allocation5 + $0x38c] sm:$0xf0]  ;;  %v2979_v47 = vor.u32 %v4146_v42, %v2978_v41  ;;  %1004 = vmatpush.bf16.msra.mxu0 %v2723_v45  ;;  %v4156_v34 = vld [vmem:[#allocation5 + $0x2e4] sm:$0xf]  ;;  %v2775_v41 = vor.u32 %v4092_v29, %v2772_v30  ;;  %v2903_v42 = vor.u32 %v4124_v31, %v2900_v33 }
  0x21   :  { %v2706_v48 = vld [vmem:[#allocation5 + $0x60] sm:$0xf]  ;;  %v4078_v49 = vld [vmem:[#allocation5 + $0x6c] sm:$0xf0]  ;;  %v3107_v51 = vor.u32 %v4178_v44, %v3106_v43  ;;  %1018 = vmatpush.bf16.msra.mxu1 %v2851_v46  ;;  %v3028_v35 = vld [vmem:[#allocation5 + $0x2f0] sm:$0xf0] }
  0x22   :  { %v2834_v50 = vld [vmem:[#allocation5 + $0x160] sm:$0xf]  ;;  %v4110_v52 = vld [vmem:[#allocation5 + $0x16c] sm:$0xf0]  ;;  %v2707_v57 = vor.u32 %v4078_v49, %v2706_v48  ;;  %1032 = vmatpush.bf16.msra.mxu2 %v2979_v47  ;;  %v4188_v38 = vld [vmem:[#allocation5 + $0x3e4] sm:$0xf]  ;;  %v3031_v43 = vor.u32 %v4156_v34, %v3028_v35 }
  0x23   :  { %v2962_v53 = vld [vmem:[#allocation5 + $0x260] sm:$0xf]  ;;  %v4142_v54 = vld [vmem:[#allocation5 + $0x26c] sm:$0xf0]  ;;  %v2835_v58 = vor.u32 %v4110_v52, %v2834_v50  ;;  %1046 = vmatpush.bf16.msra.mxu3 %v3107_v51  ;;  %v3156_v39 = vld [vmem:[#allocation5 + $0x3f0] sm:$0xf0] }
  0x24   :  { %v3090_v55 = vld [vmem:[#allocation5 + $0x360] sm:$0xf]  ;;  %v4174_v56 = vld [vmem:[#allocation5 + $0x36c] sm:$0xf0]  ;;  %v2963_v59 = vor.u32 %v4142_v54, %v2962_v53  ;;  %1005 = vmatpush.bf16.msra.mxu0 %v2707_v57  ;;  %v4088_v44 = vld [vmem:[#allocation5 + $0xc4] sm:$0xf]  ;;  %v3159_v47 = vor.u32 %v4188_v38, %v3156_v39 }
  0x25   :  { %v2690_v60 = vld [vmem:[#allocation5 + $0x40] sm:$0xf]  ;;  %v4074_v61 = vld [vmem:[#allocation5 + $0x4c] sm:$0xf0]  ;;  %v3091_v63 = vor.u32 %v4174_v56, %v3090_v55  ;;  %1019 = vmatpush.bf16.msra.mxu1 %v2835_v58  ;;  %v2756_v45 = vld [vmem:[#allocation5 + $0xd0] sm:$0xf0] }
  0x26   :  { %v2818_v62 = vld [vmem:[#allocation5 + $0x140] sm:$0xf]  ;;  %v4106_v0 = vld [vmem:[#allocation5 + $0x14c] sm:$0xf0]  ;;  %v2691_v5 = vor.u32 %v4074_v61, %v2690_v60  ;;  %1033 = vmatpush.bf16.msra.mxu2 %v2963_v59  ;;  %v4120_v46 = vld [vmem:[#allocation5 + $0x1c4] sm:$0xf]  ;;  %v2759_v53 = vor.u32 %v4088_v44, %v2756_v45 }
  0x27   :  { %v2946_v1 = vld [vmem:[#allocation5 + $0x240] sm:$0xf]  ;;  %v4138_v2 = vld [vmem:[#allocation5 + $0x24c] sm:$0xf0]  ;;  %v2819_v6 = vor.u32 %v4106_v0, %v2818_v62  ;;  %1047 = vmatpush.bf16.msra.mxu3 %v3091_v63  ;;  %v2884_v48 = vld [vmem:[#allocation5 + $0x1d0] sm:$0xf0] }
  0x28   :  { %v3074_v3 = vld [vmem:[#allocation5 + $0x340] sm:$0xf]  ;;  %v4170_v4 = vld [vmem:[#allocation5 + $0x34c] sm:$0xf0]  ;;  %v2947_v7 = vor.u32 %v4138_v2, %v2946_v1  ;;  %1006 = vmatpush.bf16.msra.mxu0 %v2691_v5  ;;  %v4152_v49 = vld [vmem:[#allocation5 + $0x2c4] sm:$0xf]  ;;  %v2887_v57 = vor.u32 %v4120_v46, %v2884_v48 }
  0x29   :  { %v2674_v8 = vld [vmem:[#allocation5 + $0x20] sm:$0xf]  ;;  %v4070_v9 = vld [vmem:[#allocation5 + $0x2c] sm:$0xf0]  ;;  %v3075_v11 = vor.u32 %v4170_v4, %v3074_v3  ;;  %1020 = vmatpush.bf16.msra.mxu1 %v2819_v6  ;;  %v3012_v50 = vld [vmem:[#allocation5 + $0x2d0] sm:$0xf0] }
  0x2a   :  { %v2802_v10 = vld [vmem:[#allocation5 + $0x120] sm:$0xf]  ;;  %v4102_v12 = vld [vmem:[#allocation5 + $0x12c] sm:$0xf0]  ;;  %v2675_v17 = vor.u32 %v4070_v9, %v2674_v8  ;;  %1034 = vmatpush.bf16.msra.mxu2 %v2947_v7  ;;  %v4184_v51 = vld [vmem:[#allocation5 + $0x3c4] sm:$0xf]  ;;  %v3015_v58 = vor.u32 %v4152_v49, %v3012_v50 }
  0x2b   :  { %v2930_v13 = vld [vmem:[#allocation5 + $0x220] sm:$0xf]  ;;  %v4134_v14 = vld [vmem:[#allocation5 + $0x22c] sm:$0xf0]  ;;  %v2803_v20 = vor.u32 %v4102_v12, %v2802_v10  ;;  %1048 = vmatpush.bf16.msra.mxu3 %v3075_v11  ;;  %v3140_v52 = vld [vmem:[#allocation5 + $0x3d0] sm:$0xf0] }
  0x2c   :  { %v3058_v15 = vld [vmem:[#allocation5 + $0x320] sm:$0xf]  ;;  %v4166_v16 = vld [vmem:[#allocation5 + $0x32c] sm:$0xf0]  ;;  %v2931_v21 = vor.u32 %v4134_v14, %v2930_v13  ;;  %1007 = vmatpush.bf16.msra.mxu0 %v2675_v17  ;;  %v4084_v54 = vld [vmem:[#allocation5 + $0xa4] sm:$0xf]  ;;  %v3143_v62 = vor.u32 %v4184_v51, %v3140_v52 }
  0x2d   :  { %v2658_v18 = vld [vmem:[#allocation5] sm:$0xf]  ;;  %v4066_v19 = vld [vmem:[#allocation5 + $0xc] sm:$0xf0]  ;;  %v3059_v25 = vor.u32 %v4166_v16, %v3058_v15  ;;  %1021 = vmatpush.bf16.msra.mxu1 %v2803_v20  ;;  %v2740_v55 = vld [vmem:[#allocation5 + $0xb0] sm:$0xf0] }
  0x2e   :  { %v2786_v22 = vld [vmem:[#allocation5 + $0x100] sm:$0xf]  ;;  %v4098_v23 = vld [vmem:[#allocation5 + $0x10c] sm:$0xf0]  ;;  %v2659_v32 = vor.u32 %v4066_v19, %v2658_v18  ;;  %1035 = vmatpush.bf16.msra.mxu2 %v2931_v21  ;;  %v4116_v56 = vld [vmem:[#allocation5 + $0x1a4] sm:$0xf]  ;;  %v2743_v6 = vor.u32 %v4084_v54, %v2740_v55 }
  0x2f   :  { %v2914_v24 = vld [vmem:[#allocation5 + $0x200] sm:$0xf]  ;;  %v4130_v26 = vld [vmem:[#allocation5 + $0x20c] sm:$0xf0]  ;;  %v2787_v36 = vor.u32 %v4098_v23, %v2786_v22  ;;  %1049 = vmatpush.bf16.msra.mxu3 %v3059_v25  ;;  %v2868_v59 = vld [vmem:[#allocation5 + $0x1b0] sm:$0xf0] }
  0x30   :  { %v3042_v27 = vld [vmem:[#allocation5 + $0x300] sm:$0xf]  ;;  %v4162_v28 = vld [vmem:[#allocation5 + $0x30c] sm:$0xf0]  ;;  %v2915_v37 = vor.u32 %v4130_v26, %v2914_v24  ;;  %1008 = vmatpush.bf16.msra.mxu0 %v2659_v32  ;;  %v4148_v60 = vld [vmem:[#allocation5 + $0x2a4] sm:$0xf]  ;;  %v2871_v11 = vor.u32 %v4116_v56, %v2868_v59 }
  0x31   :  { %v3043_v40 = vor.u32 %v4162_v28, %v3042_v27  ;;  %1022 = vmatpush.bf16.msra.mxu1 %v2787_v36  ;;  %v95_v61 = vld [vmem:[%s4560_s1 + $0x10] sm:$0xff]  ;;  %v4180_v0 = vld [vmem:[#allocation5 + $0x3a4] sm:$0xf]  ;;  %v96_v13 = vld [vmem:[%s4560_s1 + $0x18] sm:$0xff] }
  0x32   :  { %1036 = vmatpush.bf16.msra.mxu2 %v2915_v37  ;;  %v2996_v63 = vld [vmem:[#allocation5 + $0x2b0] sm:$0xf0]  ;;  %v4080_v3 = vld [vmem:[#allocation5 + $0x84] sm:$0xf] }
  0x33   :  { %1050 = vmatpush.bf16.msra.mxu3 %v3043_v40  ;;  %v99_v1 = vld [vmem:[%s4560_s1 + $0x30] sm:$0xff]  ;;  %v4112_v7 = vld [vmem:[#allocation5 + $0x184] sm:$0xf]  ;;  %v2999_v12 = vor.u32 %v4148_v60, %v2996_v63  ;;  %v100_v14 = vld [vmem:[%s4560_s1 + $0x38] sm:$0xff] }
  0x34   :  { %1057 = vmatpush.bf16.msrb.mxu0 %v2775_v41  ;;  %v3124_v2 = vld [vmem:[#allocation5 + $0x3b0] sm:$0xf0]  ;;  %v4415_v5 = vpack.c.bf16 %v99_v1, %v95_v61  ;;  %v4144_v9 = vld [vmem:[#allocation5 + $0x284] sm:$0xf]  ;;  %v4427_v17 = vpack.c.bf16 %v100_v14, %v96_v13  ;;  %v4127_v14 = vld [vmem:[#allocation5 + $0x1f4] sm:$0xf0] }
  0x35   :  { %1071 = vmatpush.bf16.msrb.mxu1 %v2903_v42  ;;  %v2724_v4 = vld [vmem:[#allocation5 + $0x90] sm:$0xf0]  ;;  %v93_v15 = vld [vmem:[%s4560_s1] sm:$0xff]  ;;  %v3127_v16 = vor.u32 %v4180_v0, %v3124_v2  ;;  %v94_v19 = vld [vmem:[%s4560_s1 + $0x8] sm:$0xff] }
  0x36   :  { %1085 = vmatpush.bf16.msrb.mxu2 %v3031_v43  ;;  %v2852_v8 = vld [vmem:[#allocation5 + $0x190] sm:$0xf0]  ;;  %v97_v18 = vld [vmem:[%s4560_s1 + $0x20] sm:$0xff]  ;;  %v98_v20 = vld [vmem:[%s4560_s1 + $0x28] sm:$0xff]  ;;  %v2727_v25 = vor.u32 %v4080_v3, %v2724_v4  ;;  %1051 = vmatmul.bf16.vlgmr.msra.gmra.mxu3 %v4427_v17 }
  0x37   :  { %1099 = vmatpush.bf16.msrb.mxu3 %v3159_v47  ;;  %v2980_v10 = vld [vmem:[#allocation5 + $0x290] sm:$0xf0]  ;;  %1037 = vmatmul.bf16.vlgmr.msra.gmra.mxu2 %v4415_v5  ;;  %v4176_v21 = vld [vmem:[#allocation5 + $0x384] sm:$0xf]  ;;  %v4438_v23 = vpack.c.bf16 %v97_v18, %v93_v15  ;;  %v4440_v24 = vpack.c.bf16 %v98_v20, %v94_v19  ;;  %v2855_v26 = vor.u32 %v4112_v7, %v2852_v8  ;;  %v3034_v15 = vld [vmem:[#allocation5 + $0x2e8] sm:$0xf] }
  0x38   :  { %1058 = vmatpush.bf16.msrb.mxu0 %v2759_v53  ;;  %v3108_v22 = vld [vmem:[#allocation5 + $0x390] sm:$0xf0]  ;;  %v2983_v27 = vor.u32 %v4144_v9, %v2980_v10  ;;  %v4076_v28 = vld [vmem:[#allocation5 + $0x64] sm:$0xf]  ;;  %v2778_v10 = vld [vmem:[#allocation5 + $0xe8] sm:$0xf] }
  0x39   :  { %1072 = vmatpush.bf16.msrb.mxu1 %v2887_v57  ;;  %v2708_v29 = vld [vmem:[#allocation5 + $0x70] sm:$0xf0]  ;;  %v4108_v30 = vld [vmem:[#allocation5 + $0x164] sm:$0xf]  ;;  %v3111_v31 = vor.u32 %v4176_v21, %v3108_v22  ;;  %1009 = vmatmul.bf16.vlgmr.msra.gmra.mxu0 %v4438_v23  ;;  %v3162_v20 = vld [vmem:[#allocation5 + $0x3e8] sm:$0xf] }
  0x3a   :  { %1086 = vmatpush.bf16.msrb.mxu2 %v3015_v58  ;;  %v2836_v32 = vld [vmem:[#allocation5 + $0x170] sm:$0xf0]  ;;  %v4140_v33 = vld [vmem:[#allocation5 + $0x264] sm:$0xf]  ;;  %1023 = vmatmul.bf16.vlgmr.msra.gmra.mxu1 %v4440_v24  ;;  %v2711_v37 = vor.u32 %v4076_v28, %v2708_v29  ;;  %v4191_v21 = vld [vmem:[#allocation5 + $0x3f4] sm:$0xf0] }
  0x3b   :  { %1100 = vmatpush.bf16.msrb.mxu3 %v3143_v62  ;;  %v2964_v34 = vld [vmem:[#allocation5 + $0x270] sm:$0xf0]  ;;  %v4172_v35 = vld [vmem:[#allocation5 + $0x364] sm:$0xf]  ;;  %v2839_v38 = vor.u32 %v4108_v30, %v2836_v32  ;;  %v2762_v28 = vld [vmem:[#allocation5 + $0xc8] sm:$0xf] }
  0x3c   :  { %1059 = vmatpush.bf16.msrb.mxu0 %v2743_v6  ;;  %v3092_v36 = vld [vmem:[#allocation5 + $0x370] sm:$0xf0]  ;;  %v2967_v39 = vor.u32 %v4140_v33, %v2964_v34  ;;  %v4072_v40 = vld [vmem:[#allocation5 + $0x44] sm:$0xf]  ;;  %v4091_v29 = vld [vmem:[#allocation5 + $0xd4] sm:$0xf0] }
  0x3d   :  { %1073 = vmatpush.bf16.msrb.mxu1 %v2871_v11  ;;  %v2692_v41 = vld [vmem:[#allocation5 + $0x50] sm:$0xf0]  ;;  %v4104_v42 = vld [vmem:[#allocation5 + $0x144] sm:$0xf]  ;;  %v3095_v43 = vor.u32 %v4172_v35, %v3092_v36  ;;  %v4095_v11 = vld [vmem:[#allocation5 + $0xf4] sm:$0xf0] }
  0x3e   :  { %1087 = vmatpush.bf16.msrb.mxu2 %v2999_v12  ;;  %v2820_v44 = vld [vmem:[#allocation5 + $0x150] sm:$0xf0]  ;;  %v4136_v45 = vld [vmem:[#allocation5 + $0x244] sm:$0xf]  ;;  %v2695_v49 = vor.u32 %v4072_v40, %v2692_v41  ;;  %v2906_v12 = vld [vmem:[#allocation5 + $0x1e8] sm:$0xf] }
  0x3f   :  { %1101 = vmatpush.bf16.msrb.mxu3 %v3127_v16  ;;  %v2948_v46 = vld [vmem:[#allocation5 + $0x250] sm:$0xf0]  ;;  %v4168_v47 = vld [vmem:[#allocation5 + $0x344] sm:$0xf]  ;;  %v2823_v50 = vor.u32 %v4104_v42, %v2820_v44  ;;  %v4159_v16 = vld [vmem:[#allocation5 + $0x2f4] sm:$0xf0] }
  0x40   :  { %1060 = vmatpush.bf16.msrb.mxu0 %v2727_v25  ;;  %v3076_v48 = vld [vmem:[#allocation5 + $0x350] sm:$0xf0]  ;;  %v2951_v51 = vor.u32 %v4136_v45, %v2948_v46  ;;  %v4068_v52 = vld [vmem:[#allocation5 + $0x24] sm:$0xf]  ;;  %v2779_v25 = vor.u32 %v4095_v11, %v2778_v10  ;;  %v2890_v30 = vld [vmem:[#allocation5 + $0x1c8] sm:$0xf] }
  0x41   :  { %1074 = vmatpush.bf16.msrb.mxu1 %v2855_v26  ;;  %v2676_v53 = vld [vmem:[#allocation5 + $0x30] sm:$0xf0]  ;;  %v4100_v54 = vld [vmem:[#allocation5 + $0x124] sm:$0xf]  ;;  %v3079_v55 = vor.u32 %v4168_v47, %v3076_v48  ;;  %v2907_v26 = vor.u32 %v4127_v14, %v2906_v12  ;;  %v4123_v32 = vld [vmem:[#allocation5 + $0x1d4] sm:$0xf0] }
  0x42   :  { %1088 = vmatpush.bf16.msrb.mxu2 %v2983_v27  ;;  %v2804_v56 = vld [vmem:[#allocation5 + $0x130] sm:$0xf0]  ;;  %v4132_v57 = vld [vmem:[#allocation5 + $0x224] sm:$0xf]  ;;  %v2679_v61 = vor.u32 %v4068_v52, %v2676_v53  ;;  %v3035_v27 = vor.u32 %v4159_v16, %v3034_v15  ;;  %v3018_v33 = vld [vmem:[#allocation5 + $0x2c8] sm:$0xf] }
  0x43   :  { %1102 = vmatpush.bf16.msrb.mxu3 %v3111_v31  ;;  %v2932_v58 = vld [vmem:[#allocation5 + $0x230] sm:$0xf0]  ;;  %v4164_v59 = vld [vmem:[#allocation5 + $0x324] sm:$0xf]  ;;  %v2807_v0 = vor.u32 %v4100_v54, %v2804_v56  ;;  %v3163_v31 = vor.u32 %v4191_v21, %v3162_v20  ;;  %v4155_v34 = vld [vmem:[#allocation5 + $0x2d4] sm:$0xf0] }
  0x44   :  { %1061 = vmatpush.bf16.msrb.mxu0 %v2711_v37  ;;  %v3060_v60 = vld [vmem:[#allocation5 + $0x330] sm:$0xf0]  ;;  %v4064_v62 = vld [vmem:[#allocation5 + $0x4] sm:$0xf]  ;;  %v2935_v1 = vor.u32 %v4132_v57, %v2932_v58  ;;  %v3146_v35 = vld [vmem:[#allocation5 + $0x3c8] sm:$0xf]  ;;  %v2763_v37 = vor.u32 %v4091_v29, %v2762_v28 }
  0x45   :  { %1075 = vmatpush.bf16.msrb.mxu1 %v2839_v38  ;;  %v2660_v63 = vld [vmem:[#allocation5 + $0x10] sm:$0xf0]  ;;  %v4096_v2 = vld [vmem:[#allocation5 + $0x104] sm:$0xf]  ;;  %v3063_v6 = vor.u32 %v4164_v59, %v3060_v60  ;;  %v4187_v36 = vld [vmem:[#allocation5 + $0x3d4] sm:$0xf0]  ;;  %v2891_v38 = vor.u32 %v4123_v32, %v2890_v30 }
  0x46   :  { %1089 = vmatpush.bf16.msrb.mxu2 %v2967_v39  ;;  %v2788_v3 = vld [vmem:[#allocation5 + $0x110] sm:$0xf0]  ;;  %v4128_v4 = vld [vmem:[#allocation5 + $0x204] sm:$0xf]  ;;  %v2663_v13 = vor.u32 %v4064_v62, %v2660_v63  ;;  %v3019_v39 = vor.u32 %v4155_v34, %v3018_v33  ;;  %v2746_v40 = vld [vmem:[#allocation5 + $0xa8] sm:$0xf] }
  0x47   :  { %1103 = vmatpush.bf16.msrb.mxu3 %v3095_v43  ;;  %v2916_v7 = vld [vmem:[#allocation5 + $0x210] sm:$0xf0]  ;;  %v4160_v8 = vld [vmem:[#allocation5 + $0x304] sm:$0xf]  ;;  %v2791_v18 = vor.u32 %v4096_v2, %v2788_v3  ;;  %v4087_v41 = vld [vmem:[#allocation5 + $0xb4] sm:$0xf0]  ;;  %v3147_v43 = vor.u32 %v4187_v36, %v3146_v35 }
  0x48   :  { %1062 = vmatpush.bf16.msrb.mxu0 %v2695_v49  ;;  %v3044_v9 = vld [vmem:[#allocation5 + $0x310] sm:$0xf0]  ;;  %v2919_v19 = vor.u32 %v4128_v4, %v2916_v7  ;;  %v2874_v42 = vld [vmem:[#allocation5 + $0x1a8] sm:$0xf]  ;;  %v4119_v44 = vld [vmem:[#allocation5 + $0x1b4] sm:$0xf0]  ;;  %v2747_v49 = vor.u32 %v4087_v41, %v2746_v40 }
  0x49   :  { %1076 = vmatpush.bf16.msrb.mxu1 %v2823_v50  ;;  %v3047_v22 = vor.u32 %v4160_v8, %v3044_v9  ;;  %v3002_v45 = vld [vmem:[#allocation5 + $0x2a8] sm:$0xf]  ;;  %v4151_v46 = vld [vmem:[#allocation5 + $0x2b4] sm:$0xf0]  ;;  %v2875_v50 = vor.u32 %v4119_v44, %v2874_v42 }
  0x4a   :  { %1090 = vmatpush.bf16.msrb.mxu2 %v2951_v51  ;;  %v3130_v47 = vld [vmem:[#allocation5 + $0x3a8] sm:$0xf]  ;;  %v4183_v48 = vld [vmem:[#allocation5 + $0x3b4] sm:$0xf0]  ;;  %v3003_v51 = vor.u32 %v4151_v46, %v3002_v45 }
  0x4b   :  { %1104 = vmatpush.bf16.msrb.mxu3 %v3079_v55  ;;  %v2730_v52 = vld [vmem:[#allocation5 + $0x88] sm:$0xf]  ;;  %v4083_v53 = vld [vmem:[#allocation5 + $0x94] sm:$0xf0]  ;;  %v3131_v55 = vor.u32 %v4183_v48, %v3130_v47 }
  0x4c   :  { %1063 = vmatpush.bf16.msrb.mxu0 %v2679_v61  ;;  %v2858_v54 = vld [vmem:[#allocation5 + $0x188] sm:$0xf]  ;;  %v4115_v56 = vld [vmem:[#allocation5 + $0x194] sm:$0xf0]  ;;  %v2731_v61 = vor.u32 %v4083_v53, %v2730_v52  ;;  %v2908_v53 = vld [vmem:[#allocation5 + $0x1f8] sm:$0xf0] }
  0x4d   :  { %1077 = vmatpush.bf16.msrb.mxu1 %v2807_v0  ;;  %v2986_v57 = vld [vmem:[#allocation5 + $0x288] sm:$0xf]  ;;  %v4147_v58 = vld [vmem:[#allocation5 + $0x294] sm:$0xf0]  ;;  %v2859_v62 = vor.u32 %v4115_v56, %v2858_v54  ;;  %v4157_v54 = vld [vmem:[#allocation5 + $0x2ec] sm:$0xf] }
  0x4e   :  { %1091 = vmatpush.bf16.msrb.mxu2 %v2935_v1  ;;  %v3114_v59 = vld [vmem:[#allocation5 + $0x388] sm:$0xf]  ;;  %v4179_v60 = vld [vmem:[#allocation5 + $0x394] sm:$0xf0]  ;;  %v2987_v63 = vor.u32 %v4147_v58, %v2986_v57  ;;  %v4189_v58 = vld [vmem:[#allocation5 + $0x3ec] sm:$0xf] }
  0x4f   :  { %1105 = vmatpush.bf16.msrb.mxu3 %v3063_v6  ;;  %v2714_v0 = vld [vmem:[#allocation5 + $0x68] sm:$0xf]  ;;  %v4079_v1 = vld [vmem:[#allocation5 + $0x74] sm:$0xf0]  ;;  %v3115_v3 = vor.u32 %v4179_v60, %v3114_v59  ;;  %v3164_v59 = vld [vmem:[#allocation5 + $0x3f8] sm:$0xf0] }
  0x50   :  { %1064 = vmatpush.bf16.msrb.mxu0 %v2663_v13  ;;  %v2842_v2 = vld [vmem:[#allocation5 + $0x168] sm:$0xf]  ;;  %v4111_v4 = vld [vmem:[#allocation5 + $0x174] sm:$0xf0]  ;;  %v2715_v10 = vor.u32 %v4079_v1, %v2714_v0  ;;  %v4089_v0 = vld [vmem:[#allocation5 + $0xcc] sm:$0xf] }
  0x51   :  { %1078 = vmatpush.bf16.msrb.mxu1 %v2791_v18  ;;  %v2970_v6 = vld [vmem:[#allocation5 + $0x268] sm:$0xf]  ;;  %v4143_v7 = vld [vmem:[#allocation5 + $0x274] sm:$0xf0]  ;;  %v2843_v11 = vor.u32 %v4111_v4, %v2842_v2  ;;  %v2764_v1 = vld [vmem:[#allocation5 + $0xd8] sm:$0xf0] }
  0x52   :  { %1092 = vmatpush.bf16.msrb.mxu2 %v2919_v19  ;;  %v3098_v8 = vld [vmem:[#allocation5 + $0x368] sm:$0xf]  ;;  %v4175_v9 = vld [vmem:[#allocation5 + $0x374] sm:$0xf0]  ;;  %v2971_v12 = vor.u32 %v4143_v7, %v2970_v6  ;;  %v4121_v2 = vld [vmem:[#allocation5 + $0x1cc] sm:$0xf] }
  0x53   :  { %1106 = vmatpush.bf16.msrb.mxu3 %v3047_v22  ;;  %1065 = vmatmul.bf16.vlgmr.msrb.gmra.mxu0 %v4438_v23  ;;  %v2698_v13 = vld [vmem:[#allocation5 + $0x48] sm:$0xf]  ;;  %v4075_v14 = vld [vmem:[#allocation5 + $0x54] sm:$0xf0]  ;;  %v3099_v16 = vor.u32 %v4175_v9, %v3098_v8  ;;  %v2892_v4 = vld [vmem:[#allocation5 + $0x1d8] sm:$0xf0] }
  0x54   :  { %1113 = vmatpush.bf16.msra.mxu0 %v2779_v25  ;;  %1079 = vmatmul.bf16.vlgmr.msrb.gmra.mxu1 %v4440_v24  ;;  %v2826_v15 = vld [vmem:[#allocation5 + $0x148] sm:$0xf]  ;;  %v4107_v18 = vld [vmem:[#allocation5 + $0x154] sm:$0xf0]  ;;  %v2699_v25 = vor.u32 %v4075_v14, %v2698_v13  ;;  %v4153_v6 = vld [vmem:[#allocation5 + $0x2cc] sm:$0xf] }
  0x55   :  { %1127 = vmatpush.bf16.msra.mxu1 %v2907_v26  ;;  %1093 = vmatmul.bf16.vlgmr.msrb.gmra.mxu2 %v4415_v5  ;;  %v2954_v19 = vld [vmem:[#allocation5 + $0x248] sm:$0xf]  ;;  %v4139_v20 = vld [vmem:[#allocation5 + $0x254] sm:$0xf0]  ;;  %v2827_v26 = vor.u32 %v4107_v18, %v2826_v15  ;;  %v3020_v7 = vld [vmem:[#allocation5 + $0x2d8] sm:$0xf0] }
  0x56   :  { %1141 = vmatpush.bf16.msra.mxu2 %v3035_v27  ;;  %1107 = vmatmul.bf16.vlgmr.msrb.gmra.mxu3 %v4427_v17  ;;  %v3082_v21 = vld [vmem:[#allocation5 + $0x348] sm:$0xf]  ;;  %v4171_v22 = vld [vmem:[#allocation5 + $0x354] sm:$0xf0]  ;;  %v2955_v27 = vor.u32 %v4139_v20, %v2954_v19  ;;  %v4185_v8 = vld [vmem:[#allocation5 + $0x3cc] sm:$0xf] }
  0x57   :  { %1155 = vmatpush.bf16.msra.mxu3 %v3163_v31  ;;  %v2682_v28 = vld [vmem:[#allocation5 + $0x28] sm:$0xf]  ;;  %v4071_v29 = vld [vmem:[#allocation5 + $0x34] sm:$0xf0]  ;;  %v3083_v31 = vor.u32 %v4171_v22, %v3082_v21  ;;  %v3148_v9 = vld [vmem:[#allocation5 + $0x3d8] sm:$0xf0] }
  0x58   :  { %1114 = vmatpush.bf16.msra.mxu0 %v2763_v37  ;;  %v2810_v30 = vld [vmem:[#allocation5 + $0x128] sm:$0xf]  ;;  %v4103_v32 = vld [vmem:[#allocation5 + $0x134] sm:$0xf0]  ;;  %v2683_v37 = vor.u32 %v4071_v29, %v2682_v28  ;;  %v4085_v13 = vld [vmem:[#allocation5 + $0xac] sm:$0xf] }
  0x59   :  { %1128 = vmatpush.bf16.msra.mxu1 %v2891_v38  ;;  %v2938_v33 = vld [vmem:[#allocation5 + $0x228] sm:$0xf]  ;;  %v4135_v34 = vld [vmem:[#allocation5 + $0x234] sm:$0xf0]  ;;  %v2811_v40 = vor.u32 %v4103_v32, %v2810_v30  ;;  %v2748_v14 = vld [vmem:[#allocation5 + $0xb8] sm:$0xf0] }
  0x5a   :  { %1142 = vmatpush.bf16.msra.mxu2 %v3019_v39  ;;  %v3066_v35 = vld [vmem:[#allocation5 + $0x328] sm:$0xf]  ;;  %v4167_v36 = vld [vmem:[#allocation5 + $0x334] sm:$0xf0]  ;;  %v2939_v41 = vor.u32 %v4135_v34, %v2938_v33  ;;  %v4117_v15 = vld [vmem:[#allocation5 + $0x1ac] sm:$0xf] }
  0x5b   :  { %1156 = vmatpush.bf16.msra.mxu3 %v3147_v43  ;;  %v2666_v38 = vld [vmem:[#allocation5 + $0x8] sm:$0xf]  ;;  %v4067_v39 = vld [vmem:[#allocation5 + $0x14] sm:$0xf0]  ;;  %v3067_v45 = vor.u32 %v4167_v36, %v3066_v35  ;;  %v2876_v18 = vld [vmem:[#allocation5 + $0x1b8] sm:$0xf0] }
  0x5c   :  { %1115 = vmatpush.bf16.msra.mxu0 %v2747_v49  ;;  %v2794_v42 = vld [vmem:[#allocation5 + $0x108] sm:$0xf]  ;;  %v4099_v43 = vld [vmem:[#allocation5 + $0x114] sm:$0xf0]  ;;  %v4093_v49 = vld [vmem:[#allocation5 + $0xec] sm:$0xf]  ;;  %v2667_v52 = vor.u32 %v4067_v39, %v2666_v38 }
  0x5d   :  { %1129 = vmatpush.bf16.msra.mxu1 %v2875_v50  ;;  %v2922_v44 = vld [vmem:[#allocation5 + $0x208] sm:$0xf]  ;;  %v4131_v46 = vld [vmem:[#allocation5 + $0x214] sm:$0xf0]  ;;  %v2780_v50 = vld [vmem:[#allocation5 + $0xf8] sm:$0xf0]  ;;  %v2795_v56 = vor.u32 %v4099_v43, %v2794_v42 }
  0x5e   :  { %1143 = vmatpush.bf16.msra.mxu2 %v3003_v51  ;;  %v3050_v47 = vld [vmem:[#allocation5 + $0x308] sm:$0xf]  ;;  %v4163_v48 = vld [vmem:[#allocation5 + $0x314] sm:$0xf0]  ;;  %v4125_v51 = vld [vmem:[#allocation5 + $0x1ec] sm:$0xf]  ;;  %v2923_v57 = vor.u32 %v4131_v46, %v2922_v44 }
  0x5f   :  { %1157 = vmatpush.bf16.msra.mxu3 %v3131_v55  ;;  %v3036_v55 = vld [vmem:[#allocation5 + $0x2f8] sm:$0xf0]  ;;  %v3051_v60 = vor.u32 %v4163_v48, %v3050_v47  ;;  %v4149_v19 = vld [vmem:[#allocation5 + $0x2ac] sm:$0xf] }
  0x60   :  { %1116 = vmatpush.bf16.msra.mxu0 %v2731_v61  ;;  %v2783_v61 = vor.u32 %v4093_v49, %v2780_v50  ;;  %v3004_v20 = vld [vmem:[#allocation5 + $0x2b8] sm:$0xf0]  ;;  %v4181_v21 = vld [vmem:[#allocation5 + $0x3ac] sm:$0xf] }
  0x61   :  { %1130 = vmatpush.bf16.msra.mxu1 %v2859_v62  ;;  %v2911_v62 = vor.u32 %v4125_v51, %v2908_v53  ;;  %v3132_v22 = vld [vmem:[#allocation5 + $0x3b8] sm:$0xf0]  ;;  %v4081_v28 = vld [vmem:[#allocation5 + $0x8c] sm:$0xf] }
  0x62   :  { %1144 = vmatpush.bf16.msra.mxu2 %v2987_v63  ;;  %v3039_v63 = vor.u32 %v4157_v54, %v3036_v55  ;;  %v2732_v29 = vld [vmem:[#allocation5 + $0x98] sm:$0xf0]  ;;  %v4113_v30 = vld [vmem:[#allocation5 + $0x18c] sm:$0xf] }
  0x63   :  { %1158 = vmatpush.bf16.msra.mxu3 %v3115_v3  ;;  %v3167_v3 = vor.u32 %v4189_v58, %v3164_v59  ;;  %v2860_v32 = vld [vmem:[#allocation5 + $0x198] sm:$0xf0]  ;;  %v4145_v33 = vld [vmem:[#allocation5 + $0x28c] sm:$0xf] }
  0x64   :  { %1117 = vmatpush.bf16.msra.mxu0 %v2715_v10  ;;  %v2767_v10 = vor.u32 %v4089_v0, %v2764_v1  ;;  %v2988_v34 = vld [vmem:[#allocation5 + $0x298] sm:$0xf0]  ;;  %v4177_v35 = vld [vmem:[#allocation5 + $0x38c] sm:$0xf]  ;;  %v2863_v38 = vor.u32 %v4113_v30, %v2860_v32  ;;  %v3538_v30 = vld [vmem:[#allocation3 + $0x2e0] sm:$0xf] }
  0x65   :  { %1131 = vmatpush.bf16.msra.mxu1 %v2843_v11  ;;  %v2895_v11 = vor.u32 %v4121_v2, %v2892_v4  ;;  %v3116_v36 = vld [vmem:[#allocation5 + $0x398] sm:$0xf0]  ;;  %v2991_v39 = vor.u32 %v4145_v33, %v2988_v34  ;;  %v4109_v42 = vld [vmem:[#allocation5 + $0x16c] sm:$0xf]  ;;  %v3666_v34 = vld [vmem:[#allocation3 + $0x3e0] sm:$0xf] }
  0x66   :  { %1145 = vmatpush.bf16.msra.mxu2 %v2971_v12  ;;  %v3023_v12 = vor.u32 %v4153_v6, %v3020_v7  ;;  %v3119_v43 = vor.u32 %v4177_v35, %v3116_v36  ;;  %v2844_v44 = vld [vmem:[#allocation5 + $0x178] sm:$0xf0]  ;;  %v4173_v47 = vld [vmem:[#allocation5 + $0x36c] sm:$0xf]  ;;  %v4062_v35 = vld [vmem:[#allocation3 + $0x3ec] sm:$0xf0] }
  0x67   :  { %1159 = vmatpush.bf16.msra.mxu3 %v3099_v16  ;;  %v3151_v16 = vor.u32 %v4185_v8, %v3148_v9  ;;  %v2972_v46 = vld [vmem:[#allocation5 + $0x278] sm:$0xf0]  ;;  %v2847_v50 = vor.u32 %v4109_v42, %v2844_v44  ;;  %v4105_v54 = vld [vmem:[#allocation5 + $0x14c] sm:$0xf]  ;;  %v3394_v42 = vld [vmem:[#allocation3 + $0x1c0] sm:$0xf] }
  0x68   :  { %1118 = vmatpush.bf16.msra.mxu0 %v2699_v25  ;;  %v2751_v25 = vor.u32 %v4085_v13, %v2748_v14  ;;  %v3100_v48 = vld [vmem:[#allocation5 + $0x378] sm:$0xf0]  ;;  %v4169_v59 = vld [vmem:[#allocation5 + $0x34c] sm:$0xf]  ;;  %v3994_v44 = vld [vmem:[#allocation3 + $0x1cc] sm:$0xf0] }
  0x69   :  { %1132 = vmatpush.bf16.msra.mxu1 %v2827_v26  ;;  %v2879_v26 = vor.u32 %v4117_v15, %v2876_v18  ;;  %v2700_v53 = vld [vmem:[#allocation5 + $0x58] sm:$0xf0]  ;;  %v3103_v55 = vor.u32 %v4173_v47, %v3100_v48  ;;  %v4069_v0 = vld [vmem:[#allocation5 + $0x2c] sm:$0xf]  ;;  %v3650_v47 = vld [vmem:[#allocation3 + $0x3c0] sm:$0xf] }
  0x6a   :  { %1146 = vmatpush.bf16.msra.mxu2 %v2955_v27  ;;  %v3007_v27 = vor.u32 %v4149_v19, %v3004_v20  ;;  %v2956_v58 = vld [vmem:[#allocation5 + $0x258] sm:$0xf0]  ;;  %v4101_v2 = vld [vmem:[#allocation5 + $0x12c] sm:$0xf]  ;;  %v4058_v48 = vld [vmem:[#allocation3 + $0x3cc] sm:$0xf0] }
  0x6b   :  { %1160 = vmatpush.bf16.msra.mxu3 %v3083_v31  ;;  %v3135_v31 = vor.u32 %v4181_v21, %v3132_v22  ;;  %v2684_v1 = vld [vmem:[#allocation5 + $0x38] sm:$0xf0]  ;;  %v4133_v6 = vld [vmem:[#allocation5 + $0x22c] sm:$0xf] }
  0x6c   :  { %1119 = vmatpush.bf16.msra.mxu0 %v2683_v37  ;;  %v2735_v37 = vor.u32 %v4081_v28, %v2732_v29  ;;  %v2812_v4 = vld [vmem:[#allocation5 + $0x138] sm:$0xf0]  ;;  %v4165_v8 = vld [vmem:[#allocation5 + $0x32c] sm:$0xf]  ;;  %v3998_v29 = vld [vmem:[#allocation3 + $0x1ec] sm:$0xf0] }
  0x6d   :  { %1133 = vmatpush.bf16.msra.mxu1 %v2811_v40  ;;  %v4077_v40 = vld [vmem:[#allocation5 + $0x6c] sm:$0xf]  ;;  %v2940_v7 = vld [vmem:[#allocation5 + $0x238] sm:$0xf0]  ;;  %v2815_v13 = vor.u32 %v4101_v2, %v2812_v4  ;;  %v3362_v2 = vld [vmem:[#allocation3 + $0x180] sm:$0xf] }
  0x6e   :  { %1147 = vmatpush.bf16.msra.mxu2 %v2939_v41  ;;  %v2716_v41 = vld [vmem:[#allocation5 + $0x78] sm:$0xf0]  ;;  %v2943_v14 = vor.u32 %v4133_v6, %v2940_v7  ;;  %v4097_v15 = vld [vmem:[#allocation5 + $0x10c] sm:$0xf]  ;;  %v3490_v4 = vld [vmem:[#allocation3 + $0x280] sm:$0xf] }
  0x6f   :  { %1161 = vmatpush.bf16.msra.mxu3 %v3067_v45  ;;  %v4141_v45 = vld [vmem:[#allocation5 + $0x26c] sm:$0xf]  ;;  %v2719_v49 = vor.u32 %v4077_v40, %v2716_v41  ;;  %v3068_v9 = vld [vmem:[#allocation5 + $0x338] sm:$0xf0]  ;;  %v3266_v40 = vld [vmem:[#allocation3 + $0xc0] sm:$0xf] }
  0x70   :  { %1120 = vmatpush.bf16.msra.mxu0 %v2667_v52  ;;  %v2975_v51 = vor.u32 %v4141_v45, %v2972_v46  ;;  %v4073_v52 = vld [vmem:[#allocation5 + $0x4c] sm:$0xf]  ;;  %v3071_v19 = vor.u32 %v4165_v8, %v3068_v9  ;;  %v2924_v20 = vld [vmem:[#allocation5 + $0x218] sm:$0xf0]  ;;  %v3962_v41 = vld [vmem:[#allocation3 + $0xcc] sm:$0xf0] }
  0x71   :  { %1134 = vmatpush.bf16.msra.mxu1 %v2795_v56  ;;  %v2828_v56 = vld [vmem:[#allocation5 + $0x158] sm:$0xf0]  ;;  %v4129_v18 = vld [vmem:[#allocation5 + $0x20c] sm:$0xf]  ;;  %v3522_v45 = vld [vmem:[#allocation3 + $0x2c0] sm:$0xf] }
  0x72   :  { %1148 = vmatpush.bf16.msra.mxu2 %v2923_v57  ;;  %v4137_v57 = vld [vmem:[#allocation5 + $0x24c] sm:$0xf]  ;;  %v3052_v22 = vld [vmem:[#allocation5 + $0x318] sm:$0xf0]  ;;  %v2927_v33 = vor.u32 %v4129_v18, %v2924_v20  ;;  %v4026_v46 = vld [vmem:[#allocation3 + $0x2cc] sm:$0xf0] }
  0x73   :  { %1162 = vmatpush.bf16.msra.mxu3 %v3051_v60  ;;  %1121 = vmatmul.bf16.vlgmr.msra.gmra.mxu0 %v4438_v23  ;;  %v3084_v60 = vld [vmem:[#allocation5 + $0x358] sm:$0xf0]  ;;  %v4161_v21 = vld [vmem:[#allocation5 + $0x30c] sm:$0xf]  ;;  %v4018_v6 = vld [vmem:[#allocation3 + $0x28c] sm:$0xf0] }
  0x74   :  { %1169 = vmatpush.bf16.msrb.mxu0 %v2783_v61  ;;  %1135 = vmatmul.bf16.vlgmr.msra.gmra.mxu1 %v4440_v24  ;;  %v2703_v61 = vor.u32 %v4073_v52, %v2700_v53  ;;  %v3055_v36 = vor.u32 %v4161_v21, %v3052_v22  ;;  %v3250_v52 = vld [vmem:[#allocation3 + $0xa0] sm:$0xf]  ;;  %v3958_v53 = vld [vmem:[#allocation3 + $0xac] sm:$0xf0] }
  0x75   :  { %1183 = vmatpush.bf16.msrb.mxu1 %v2911_v62  ;;  %1149 = vmatmul.bf16.vlgmr.msra.gmra.mxu2 %v4415_v5  ;;  %v2831_v62 = vor.u32 %v4105_v54, %v2828_v56  ;;  %v3378_v54 = vld [vmem:[#allocation3 + $0x1a0] sm:$0xf]  ;;  %v3990_v56 = vld [vmem:[#allocation3 + $0x1ac] sm:$0xf0] }
  0x76   :  { %1197 = vmatpush.bf16.msrb.mxu2 %v3039_v63  ;;  %1163 = vmatmul.bf16.vlgmr.msra.gmra.mxu3 %v4427_v17  ;;  %v2959_v63 = vor.u32 %v4137_v57, %v2956_v58  ;;  %v3506_v57 = vld [vmem:[#allocation3 + $0x2a0] sm:$0xf]  ;;  %v4022_v58 = vld [vmem:[#allocation3 + $0x2ac] sm:$0xf0] }
  0x77   :  { %1211 = vmatpush.bf16.msrb.mxu3 %v3167_v3  ;;  %v3087_v3 = vor.u32 %v4169_v59, %v3084_v60  ;;  %v3634_v59 = vld [vmem:[#allocation3 + $0x3a0] sm:$0xf]  ;;  %v4054_v60 = vld [vmem:[#allocation3 + $0x3ac] sm:$0xf0] }
  0x78   :  { %1170 = vmatpush.bf16.msrb.mxu0 %v2767_v10  ;;  %v2687_v10 = vor.u32 %v4069_v0, %v2684_v1  ;;  %v3234_v0 = vld [vmem:[#allocation3 + $0x80] sm:$0xf]  ;;  %v3954_v1 = vld [vmem:[#allocation3 + $0x8c] sm:$0xf0] }
  0x79   :  { %1184 = vmatpush.bf16.msrb.mxu1 %v2895_v11  ;;  %v4065_v11 = vld [vmem:[#allocation5 + $0xc] sm:$0xf]  ;;  %v3618_v7 = vld [vmem:[#allocation3 + $0x380] sm:$0xf]  ;;  %v4046_v18 = vld [vmem:[#allocation3 + $0x36c] sm:$0xf0] }
  0x7a   :  { %1198 = vmatpush.bf16.msrb.mxu2 %v3023_v12  ;;  %v2668_v12 = vld [vmem:[#allocation5 + $0x18] sm:$0xf0]  ;;  %v3218_v9 = vld [vmem:[#allocation3 + $0x60] sm:$0xf] }
  0x7b   :  { %1212 = vmatpush.bf16.msrb.mxu3 %v3151_v16  ;;  %v2796_v16 = vld [vmem:[#allocation5 + $0x118] sm:$0xf0]  ;;  %v2671_v28 = vor.u32 %v4065_v11, %v2668_v12  ;;  %v3346_v11 = vld [vmem:[#allocation3 + $0x160] sm:$0xf] }
  0x7c   :  { %1171 = vmatpush.bf16.msrb.mxu0 %v2751_v25  ;;  %v3282_v25 = vld [vmem:[#allocation3 + $0xe0] sm:$0xf]  ;;  %v2799_v32 = vor.u32 %v4097_v15, %v2796_v16  ;;  %v4014_v15 = vld [vmem:[#allocation3 + $0x26c] sm:$0xf0] }
  0x7d   :  { %1185 = vmatpush.bf16.msrb.mxu1 %v2879_v26  ;;  %v3966_v26 = vld [vmem:[#allocation3 + $0xec] sm:$0xf0]  ;;  %v3602_v16 = vld [vmem:[#allocation3 + $0x360] sm:$0xf] }
  0x7e   :  { %1199 = vmatpush.bf16.msrb.mxu2 %v3007_v27  ;;  %v3410_v27 = vld [vmem:[#allocation3 + $0x1e0] sm:$0xf] }
  0x7f   :  { %1213 = vmatpush.bf16.msrb.mxu3 %v3135_v31  ;;  %v4030_v31 = vld [vmem:[#allocation3 + $0x2ec] sm:$0xf0]  ;;  %v3202_v22 = vld [vmem:[#allocation3 + $0x40] sm:$0xf] }
  0x80   :  { %1172 = vmatpush.bf16.msrb.mxu0 %v2735_v37  ;;  %v3283_v37 = vor.u32 %v3966_v26, %v3282_v25  ;;  %v3946_v25 = vld [vmem:[#allocation3 + $0x4c] sm:$0xf0]  ;;  %v3330_v26 = vld [vmem:[#allocation3 + $0x140] sm:$0xf] }
  0x81   :  { %1186 = vmatpush.bf16.msrb.mxu1 %v2863_v38  ;;  %v3411_v38 = vor.u32 %v3998_v29, %v3410_v27  ;;  %v3603_v27 = vor.u32 %v4046_v18, %v3602_v16  ;;  %v3458_v29 = vld [vmem:[#allocation3 + $0x240] sm:$0xf] }
  0x82   :  { %1200 = vmatpush.bf16.msrb.mxu2 %v2991_v39  ;;  %v3539_v39 = vor.u32 %v4030_v31, %v3538_v30  ;;  %v4010_v30 = vld [vmem:[#allocation3 + $0x24c] sm:$0xf0]  ;;  %v3586_v31 = vld [vmem:[#allocation3 + $0x340] sm:$0xf] }
  0x83   :  { %1214 = vmatpush.bf16.msrb.mxu3 %v3119_v43  ;;  %v3667_v43 = vor.u32 %v4062_v35, %v3666_v34  ;;  %v3186_v34 = vld [vmem:[#allocation3 + $0x20] sm:$0xf] }
  0x84   :  { %1173 = vmatpush.bf16.msrb.mxu0 %v2719_v49  ;;  %v3267_v49 = vor.u32 %v3962_v41, %v3266_v40  ;;  %v3442_v41 = vld [vmem:[#allocation3 + $0x220] sm:$0xf] }
  0x85   :  { %1187 = vmatpush.bf16.msrb.mxu1 %v2847_v50  ;;  %v3395_v50 = vor.u32 %v3994_v44, %v3394_v42  ;;  %v4006_v42 = vld [vmem:[#allocation3 + $0x22c] sm:$0xf0] }
  0x86   :  { %1201 = vmatpush.bf16.msrb.mxu2 %v2975_v51  ;;  %v3523_v51 = vor.u32 %v4026_v46, %v3522_v45  ;;  %v4038_v44 = vld [vmem:[#allocation3 + $0x32c] sm:$0xf0]  ;;  %v3170_v45 = vld [vmem:[#allocation3] sm:$0xf] }
  0x87   :  { %1215 = vmatpush.bf16.msrb.mxu3 %v3103_v55  ;;  %v3651_v55 = vor.u32 %v4058_v48, %v3650_v47  ;;  %v3938_v46 = vld [vmem:[#allocation3 + $0xc] sm:$0xf0]  ;;  %v3298_v48 = vld [vmem:[#allocation3 + $0x100] sm:$0xf] }
  0x88   :  { %1174 = vmatpush.bf16.msrb.mxu0 %v2703_v61  ;;  %v3251_v61 = vor.u32 %v3958_v53, %v3250_v52  ;;  %v3443_v53 = vor.u32 %v4006_v42, %v3442_v41 }
  0x89   :  { %1188 = vmatpush.bf16.msrb.mxu1 %v2831_v62  ;;  %v3379_v62 = vor.u32 %v3990_v56, %v3378_v54  ;;  %v3554_v54 = vld [vmem:[#allocation3 + $0x300] sm:$0xf]  ;;  %v3964_v56 = vld [vmem:[#allocation3 + $0xe4] sm:$0xf] }
  0x8a   :  { %1202 = vmatpush.bf16.msrb.mxu2 %v2959_v63  ;;  %v3507_v63 = vor.u32 %v4022_v58, %v3506_v57  ;;  %v3284_v58 = vld [vmem:[#allocation3 + $0xf0] sm:$0xf0] }
  0x8b   :  { %1216 = vmatpush.bf16.msrb.mxu3 %v3087_v3  ;;  %v3635_v3 = vor.u32 %v4054_v60, %v3634_v59  ;;  %v3996_v59 = vld [vmem:[#allocation3 + $0x1e4] sm:$0xf]  ;;  %v3412_v60 = vld [vmem:[#allocation3 + $0x1f0] sm:$0xf0] }
  0x8c   :  { %1175 = vmatpush.bf16.msrb.mxu0 %v2687_v10  ;;  %v3950_v10 = vld [vmem:[#allocation3 + $0x6c] sm:$0xf0] }
  0x8d   :  { %1189 = vmatpush.bf16.msrb.mxu1 %v2815_v13  ;;  %v3982_v13 = vld [vmem:[#allocation3 + $0x16c] sm:$0xf0] }
  0x8e   :  { %1203 = vmatpush.bf16.msrb.mxu2 %v2943_v14  ;;  %v3474_v14 = vld [vmem:[#allocation3 + $0x260] sm:$0xf]  ;;  %v3347_v20 = vor.u32 %v3982_v13, %v3346_v11  ;;  %v3415_v11 = vor.u32 %v3996_v59, %v3412_v60  ;;  %v3960_v13 = vld [vmem:[#allocation3 + $0xc4] sm:$0xf]  ;;  %v3348_v60 = vld [vmem:[#allocation3 + $0x170] sm:$0xf0] }
  0x8f   :  { %1217 = vmatpush.bf16.msrb.mxu3 %v3071_v19  ;;  %v3219_v19 = vor.u32 %v3950_v10, %v3218_v9  ;;  %v3475_v21 = vor.u32 %v4014_v15, %v3474_v14  ;;  %v84_v9 = vld [vmem:[%s4559_s0 + $0x18] sm:$0xff]  ;;  %v3992_v15 = vld [vmem:[#allocation3 + $0x1c4] sm:$0xf] }
  0x90   :  { %1176 = vmatpush.bf16.msrb.mxu0 %v2671_v28  ;;  %v3978_v28 = vld [vmem:[#allocation3 + $0x14c] sm:$0xf0]  ;;  %v88_v10 = vld [vmem:[%s4559_s0 + $0x38] sm:$0xff] }
  0x91   :  { %1190 = vmatpush.bf16.msrb.mxu1 %v2799_v32  ;;  %v4042_v32 = vld [vmem:[#allocation3 + $0x34c] sm:$0xf0]  ;;  %v3331_v35 = vor.u32 %v3978_v28, %v3330_v26  ;;  %v3268_v14 = vld [vmem:[#allocation3 + $0xd0] sm:$0xf0]  ;;  %v4056_v26 = vld [vmem:[#allocation3 + $0x3c4] sm:$0xf]  ;;  %v4487_v28 = vpack.c.bf16 %v88_v10, %v84_v9 }
  0x92   :  { %1204 = vmatpush.bf16.msrb.mxu2 %v2927_v33  ;;  %v3203_v33 = vor.u32 %v3946_v25, %v3202_v22  ;;  %v3587_v40 = vor.u32 %v4042_v32, %v3586_v31  ;;  %v3956_v32 = vld [vmem:[#allocation3 + $0xa4] sm:$0xf]  ;;  %v3588_v9 = vld [vmem:[#allocation3 + $0x350] sm:$0xf0] }
  0x93   :  { %1218 = vmatpush.bf16.msrb.mxu3 %v3055_v36  ;;  %1177 = vmatmul.bf16.vlgmr.msrb.gmra.mxu0 %v4438_v23  ;;  %v3986_v23 = vld [vmem:[#allocation3 + $0x18c] sm:$0xf0]  ;;  %v3459_v36 = vor.u32 %v4010_v30, %v3458_v29  ;;  %v3271_v29 = vor.u32 %v3960_v13, %v3268_v14 }
  0x94   :  { %1865 = vmatpush.bf16.msra.mxu0 %v3283_v37  ;;  %1191 = vmatmul.bf16.vlgmr.msrb.gmra.mxu1 %v4440_v24  ;;  %v3235_v24 = vor.u32 %v3954_v1, %v3234_v0  ;;  %v3363_v8 = vor.u32 %v3986_v23, %v3362_v2  ;;  %v3942_v37 = vld [vmem:[#allocation3 + $0x2c] sm:$0xf0]  ;;  %v3171_v0 = vor.u32 %v3938_v46, %v3170_v45  ;;  %v3668_v1 = vld [vmem:[#allocation3 + $0x3f0] sm:$0xf0]  ;;  %v81_v2 = vld [vmem:[%s4559_s0] sm:$0xff] }
  0x95   :  { %1879 = vmatpush.bf16.msra.mxu1 %v3411_v38  ;;  %1205 = vmatmul.bf16.vlgmr.msrb.gmra.mxu2 %v4415_v5  ;;  %v4050_v5 = vld [vmem:[#allocation3 + $0x38c] sm:$0xf0]  ;;  %v3314_v38 = vld [vmem:[#allocation3 + $0x120] sm:$0xf]  ;;  %v3187_v47 = vor.u32 %v3942_v37, %v3186_v34  ;;  %v3988_v34 = vld [vmem:[#allocation3 + $0x1a4] sm:$0xf] }
  0x96   :  { %1893 = vmatpush.bf16.msra.mxu2 %v3539_v39  ;;  %1219 = vmatmul.bf16.vlgmr.msrb.gmra.mxu3 %v4427_v17  ;;  %v3491_v17 = vor.u32 %v4018_v6, %v3490_v4  ;;  %v3619_v12 = vor.u32 %v4050_v5, %v3618_v7  ;;  %v3974_v39 = vld [vmem:[#allocation3 + $0x12c] sm:$0xf0]  ;;  %v82_v5 = vld [vmem:[%s4559_s0 + $0x8] sm:$0xff]  ;;  %v3236_v45 = vld [vmem:[#allocation3 + $0x90] sm:$0xf0] }
  0x97   :  { %1907 = vmatpush.bf16.msra.mxu3 %v3667_v43  ;;  %v3570_v43 = vld [vmem:[#allocation3 + $0x320] sm:$0xf]  ;;  %v3315_v52 = vor.u32 %v3974_v39, %v3314_v38  ;;  %v83_v6 = vld [vmem:[%s4559_s0 + $0x10] sm:$0xff]  ;;  %v4020_v37 = vld [vmem:[#allocation3 + $0x2a4] sm:$0xf] }
  0x98   :  { %1866 = vmatpush.bf16.msra.mxu0 %v3267_v49  ;;  %v3970_v49 = vld [vmem:[#allocation3 + $0x10c] sm:$0xf0]  ;;  %v3571_v57 = vor.u32 %v4038_v44, %v3570_v43  ;;  %v3508_v38 = vld [vmem:[#allocation3 + $0x2b0] sm:$0xf0]  ;;  %v4052_v39 = vld [vmem:[#allocation3 + $0x3a4] sm:$0xf] }
  0x99   :  { %1880 = vmatpush.bf16.msra.mxu1 %v3395_v50  ;;  %v3426_v50 = vld [vmem:[#allocation3 + $0x200] sm:$0xf]  ;;  %v3299_v23 = vor.u32 %v3970_v49, %v3298_v48  ;;  %v87_v7 = vld [vmem:[%s4559_s0 + $0x30] sm:$0xff]  ;;  %v3511_v43 = vor.u32 %v4020_v37, %v3508_v38  ;;  %v3952_v44 = vld [vmem:[#allocation3 + $0x84] sm:$0xf] }
  0x9a   :  { %1894 = vmatpush.bf16.msra.mxu2 %v3523_v51  ;;  %v4002_v51 = vld [vmem:[#allocation3 + $0x20c] sm:$0xf0]  ;;  %v4483_v22 = vpack.c.bf16 %v87_v7, %v83_v6  ;;  %v3984_v46 = vld [vmem:[#allocation3 + $0x184] sm:$0xf]  ;;  %v3364_v48 = vld [vmem:[#allocation3 + $0x190] sm:$0xf0] }
  0x9b   :  { %1908 = vmatpush.bf16.msra.mxu3 %v3651_v55  ;;  %v4034_v55 = vld [vmem:[#allocation3 + $0x30c] sm:$0xf0]  ;;  %v3427_v4 = vor.u32 %v4002_v51, %v3426_v50  ;;  %v4016_v49 = vld [vmem:[#allocation3 + $0x284] sm:$0xf]  ;;  %v3492_v50 = vld [vmem:[#allocation3 + $0x290] sm:$0xf0] }
  0x9c   :  { %1867 = vmatpush.bf16.msra.mxu0 %v3251_v61  ;;  %v4028_v61 = vld [vmem:[#allocation3 + $0x2e4] sm:$0xf] }
  0x9d   :  { %1881 = vmatpush.bf16.msra.mxu1 %v3379_v62  ;;  %v3540_v62 = vld [vmem:[#allocation3 + $0x2f0] sm:$0xf0]  ;;  %v4048_v51 = vld [vmem:[#allocation3 + $0x384] sm:$0xf] }
  0x9e   :  { %1895 = vmatpush.bf16.msra.mxu2 %v3507_v63  ;;  %v4060_v63 = vld [vmem:[#allocation3 + $0x3e4] sm:$0xf] }
  0x9f   :  { %1909 = vmatpush.bf16.msra.mxu3 %v3635_v3  ;;  %v85_v3 = vld [vmem:[%s4559_s0 + $0x20] sm:$0xff]  ;;  %v3671_v16 = vor.u32 %v4060_v63, %v3668_v1 }
  0xa0   :  { %1868 = vmatpush.bf16.msra.mxu0 %v3235_v24  ;;  %v3555_v24 = vor.u32 %v4034_v55, %v3554_v54  ;;  %v4481_v18 = vpack.c.bf16 %v85_v3, %v81_v2  ;;  %v3367_v54 = vor.u32 %v3984_v46, %v3364_v48  ;;  %v3495_v55 = vor.u32 %v4016_v49, %v3492_v50  ;;  %v4044_v63 = vld [vmem:[#allocation3 + $0x364] sm:$0xf]  ;;  %v3290_v48 = vld [vmem:[#allocation3 + $0xe8] sm:$0xf]  ;;  %v3967_v49 = vld [vmem:[#allocation3 + $0xf4] sm:$0xf0] }
  0xa1   :  { %1882 = vmatpush.bf16.msra.mxu1 %v3363_v8  ;;  %v3287_v8 = vor.u32 %v3964_v56, %v3284_v58  ;;  %v3948_v56 = vld [vmem:[#allocation3 + $0x64] sm:$0xf]  ;;  %v3418_v50 = vld [vmem:[#allocation3 + $0x1e8] sm:$0xf] }
  0xa2   :  { %1896 = vmatpush.bf16.msra.mxu2 %v3491_v17  ;;  %v86_v17 = vld [vmem:[%s4559_s0 + $0x28] sm:$0xff] }
  0xa3   :  { %1910 = vmatpush.bf16.msra.mxu3 %v3619_v12  ;;  %v3543_v12 = vor.u32 %v4028_v61, %v3540_v62  ;;  %v4485_v25 = vpack.c.bf16 %v86_v17, %v82_v5  ;;  %v3980_v58 = vld [vmem:[#allocation3 + $0x164] sm:$0xf]  ;;  %v3476_v62 = vld [vmem:[#allocation3 + $0x270] sm:$0xf0] }
  0xa4   :  { %1869 = vmatpush.bf16.msra.mxu0 %v3219_v19  ;;  %v3396_v19 = vld [vmem:[#allocation3 + $0x1d0] sm:$0xf0]  ;;  %v4012_v61 = vld [vmem:[#allocation3 + $0x264] sm:$0xf]  ;;  %v3351_v2 = vor.u32 %v3980_v58, %v3348_v60  ;;  %v4063_v58 = vld [vmem:[#allocation3 + $0x3f4] sm:$0xf0]  ;;  %v3291_v60 = vor.u32 %v3967_v49, %v3290_v48 }
  0xa5   :  { %1883 = vmatpush.bf16.msra.mxu1 %v3347_v20  ;;  %v4024_v20 = vld [vmem:[#allocation3 + $0x2c4] sm:$0xf]  ;;  %v3399_v30 = vor.u32 %v3992_v15, %v3396_v19  ;;  %v3479_v3 = vor.u32 %v4012_v61, %v3476_v62  ;;  %v3332_v5 = vld [vmem:[#allocation3 + $0x150] sm:$0xf0] }
  0xa6   :  { %1897 = vmatpush.bf16.msra.mxu2 %v3475_v21  ;;  %v3524_v21 = vld [vmem:[#allocation3 + $0x2d0] sm:$0xf0]  ;;  %v3976_v6 = vld [vmem:[#allocation3 + $0x144] sm:$0xf] }
  0xa7   :  { %1911 = vmatpush.bf16.msra.mxu3 %v3603_v27  ;;  %v3652_v27 = vld [vmem:[#allocation3 + $0x3d0] sm:$0xf0]  ;;  %v3527_v31 = vor.u32 %v4024_v20, %v3524_v21  ;;  %v4040_v17 = vld [vmem:[#allocation3 + $0x344] sm:$0xf]  ;;  %v3335_v13 = vor.u32 %v3976_v6, %v3332_v5  ;;  %v3658_v6 = vld [vmem:[#allocation3 + $0x3c8] sm:$0xf] }
  0xa8   :  { %1870 = vmatpush.bf16.msra.mxu0 %v3203_v33  ;;  %v3252_v33 = vld [vmem:[#allocation3 + $0xb0] sm:$0xf0]  ;;  %v3940_v15 = vld [vmem:[#allocation3 + $0x24] sm:$0xf]  ;;  %v3591_v21 = vor.u32 %v4040_v17, %v3588_v9  ;;  %v3258_v9 = vld [vmem:[#allocation3 + $0xa8] sm:$0xf] }
  0xa9   :  { %1884 = vmatpush.bf16.msra.mxu1 %v3331_v35  ;;  %v3655_v35 = vor.u32 %v4056_v26, %v3652_v27  ;;  %v3255_v41 = vor.u32 %v3956_v32, %v3252_v33  ;;  %v3972_v19 = vld [vmem:[#allocation3 + $0x124] sm:$0xf]  ;;  %v3316_v26 = vld [vmem:[#allocation3 + $0x130] sm:$0xf0] }
  0xaa   :  { %1898 = vmatpush.bf16.msra.mxu2 %v3459_v36  ;;  %v3380_v36 = vld [vmem:[#allocation3 + $0x1b0] sm:$0xf0]  ;;  %v4004_v27 = vld [vmem:[#allocation3 + $0x224] sm:$0xf]  ;;  %v3319_v38 = vor.u32 %v3972_v19, %v3316_v26  ;;  %v3642_v19 = vld [vmem:[#allocation3 + $0x3a8] sm:$0xf] }
  0xab   :  { %1912 = vmatpush.bf16.msra.mxu3 %v3587_v40  ;;  %v3636_v40 = vld [vmem:[#allocation3 + $0x3b0] sm:$0xf0]  ;;  %v3383_v42 = vor.u32 %v3988_v34, %v3380_v36  ;;  %v4032_v46 = vld [vmem:[#allocation3 + $0x304] sm:$0xf] }
  0xac   :  { %1871 = vmatpush.bf16.msra.mxu0 %v3187_v47  ;;  %v3639_v47 = vor.u32 %v4052_v39, %v3636_v40  ;;  %v3572_v32 = vld [vmem:[#allocation3 + $0x330] sm:$0xf0]  ;;  %v3968_v40 = vld [vmem:[#allocation3 + $0x104] sm:$0xf] }
  0xad   :  { %1885 = vmatpush.bf16.msra.mxu1 %v3315_v52  ;;  %v3620_v52 = vld [vmem:[#allocation3 + $0x390] sm:$0xf0] }
  0xae   :  { %1899 = vmatpush.bf16.msra.mxu2 %v3443_v53  ;;  %v3239_v53 = vor.u32 %v3952_v44, %v3236_v45  ;;  %v3623_v59 = vor.u32 %v4048_v51, %v3620_v52  ;;  %v3172_v36 = vld [vmem:[#allocation3 + $0x10] sm:$0xf0]  ;;  %v3999_v52 = vld [vmem:[#allocation3 + $0x1f4] sm:$0xf0] }
  0xaf   :  { %1913 = vmatpush.bf16.msra.mxu3 %v3571_v57  ;;  %v3220_v57 = vld [vmem:[#allocation3 + $0x70] sm:$0xf0]  ;;  %v3419_v61 = vor.u32 %v3999_v52, %v3418_v50  ;;  %v3983_v50 = vld [vmem:[#allocation3 + $0x174] sm:$0xf0] }
  0xb0   :  { %1872 = vmatpush.bf16.msra.mxu0 %v3171_v0  ;;  %v3604_v0 = vld [vmem:[#allocation3 + $0x370] sm:$0xf0]  ;;  %v3223_v1 = vor.u32 %v3948_v56, %v3220_v57  ;;  %v3674_v57 = vld [vmem:[#allocation3 + $0x3e8] sm:$0xf]  ;;  %v4015_v52 = vld [vmem:[#allocation3 + $0x274] sm:$0xf0] }
  0xb1   :  { %1886 = vmatpush.bf16.msra.mxu1 %v3299_v23  ;;  %v3944_v23 = vld [vmem:[#allocation3 + $0x44] sm:$0xf]  ;;  %v3607_v7 = vor.u32 %v4044_v63, %v3604_v0  ;;  %v3428_v45 = vld [vmem:[#allocation3 + $0x210] sm:$0xf0]  ;;  %v3274_v63 = vld [vmem:[#allocation3 + $0xc8] sm:$0xf] }
  0xb2   :  { %1900 = vmatpush.bf16.msra.mxu2 %v3427_v4  ;;  %v3204_v4 = vld [vmem:[#allocation3 + $0x50] sm:$0xf0]  ;;  %v3963_v0 = vld [vmem:[#allocation3 + $0xd4] sm:$0xf0] }
  0xb3   :  { %1914 = vmatpush.bf16.msra.mxu3 %v3555_v24  ;;  %1873 = vmatmul.bf16.vlgmr.msra.gmra.mxu0 %v4481_v18  ;;  %v4008_v24 = vld [vmem:[#allocation3 + $0x244] sm:$0xf]  ;;  %v3207_v10 = vor.u32 %v3944_v23, %v3204_v4  ;;  %v3530_v23 = vld [vmem:[#allocation3 + $0x2c8] sm:$0xf]  ;;  %v4027_v4 = vld [vmem:[#allocation3 + $0x2d4] sm:$0xf0]  ;;  %v3275_v5 = vor.u32 %v3963_v0, %v3274_v63 }
  0xb4   :  { %1921 = vmatpush.bf16.msrb.mxu0 %v3287_v8  ;;  %1887 = vmatmul.bf16.vlgmr.msra.gmra.mxu1 %v4485_v25  ;;  %v3460_v8 = vld [vmem:[#allocation3 + $0x250] sm:$0xf0]  ;;  %v3531_v17 = vor.u32 %v4027_v4, %v3530_v23  ;;  %v3979_v0 = vld [vmem:[#allocation3 + $0x154] sm:$0xf0]  ;;  %v3594_v4 = vld [vmem:[#allocation3 + $0x348] sm:$0xf] }
  0xb5   :  { %1935 = vmatpush.bf16.msrb.mxu1 %v3415_v11  ;;  %1901 = vmatmul.bf16.vlgmr.msra.gmra.mxu2 %v4483_v22  ;;  %v3463_v14 = vor.u32 %v4008_v24, %v3460_v8 }
  0xb6   :  { %1949 = vmatpush.bf16.msrb.mxu2 %v3543_v12  ;;  %1915 = vmatmul.bf16.vlgmr.msra.gmra.mxu3 %v4487_v28  ;;  %v1010_v11 = vpop.f32.mrf.mxu0 }
  0xb7   :  { %1963 = vmatpush.bf16.msrb.mxu3 %v3671_v16  ;;  %v1024_v12 = vpop.f32.mrf.mxu1  ;;  %v3188_v16 = vld [vmem:[#allocation3 + $0x30] sm:$0xf0] }
  0xb8   :  { %1922 = vmatpush.bf16.msrb.mxu0 %v3271_v29  ;;  %v1025_v20 = vadd.f32 %v1024_v12, %v1010_v11  ;;  %v3444_v29 = vld [vmem:[#allocation3 + $0x230] sm:$0xf0]  ;;  %v3191_v34 = vor.u32 %v3940_v15, %v3188_v16  ;;  %v3386_v11 = vld [vmem:[#allocation3 + $0x1a8] sm:$0xf]  ;;  %v4023_v16 = vld [vmem:[#allocation3 + $0x2b4] sm:$0xf0] }
  0xb9   :  { %1936 = vmatpush.bf16.msrb.mxu1 %v3399_v30  ;;  %v1052_v37 = vpop.f32.mrf.mxu3  ;;  %v3447_v39 = vor.u32 %v4004_v27, %v3444_v29  ;;  %v3514_v15 = vld [vmem:[#allocation3 + $0x2a8] sm:$0xf] }
  0xba   :  { %1950 = vmatpush.bf16.msrb.mxu2 %v3527_v31  ;;  %v1038_v30 = vpop.f32.mrf.mxu2  ;;  %v4036_v31 = vld [vmem:[#allocation3 + $0x324] sm:$0xf]  ;;  %v3515_v27 = vor.u32 %v4023_v16, %v3514_v15  ;;  %v3242_v29 = vld [vmem:[#allocation3 + $0x88] sm:$0xf]  ;;  %v3975_v16 = vld [vmem:[#allocation3 + $0x134] sm:$0xf0] }
  0xbb   :  { %1964 = vmatpush.bf16.msrb.mxu3 %v3655_v35  ;;  %v1039_v33 = vadd.f32 %v1038_v30, %v1025_v20  ;;  %v3936_v35 = vld [vmem:[#allocation3 + $0x4] sm:$0xf]  ;;  %v3575_v44 = vor.u32 %v4036_v31, %v3572_v32  ;;  %v4055_v20 = vld [vmem:[#allocation3 + $0x3b4] sm:$0xf0]  ;;  %v3370_v31 = vld [vmem:[#allocation3 + $0x188] sm:$0xf] }
  0xbc   :  { %1923 = vmatpush.bf16.msrb.mxu0 %v3255_v41  ;;  %v3300_v41 = vld [vmem:[#allocation3 + $0x110] sm:$0xf0]  ;;  %v3175_v51 = vor.u32 %v3936_v35, %v3172_v36  ;;  %v3955_v30 = vld [vmem:[#allocation3 + $0x94] sm:$0xf0]  ;;  %v3498_v35 = vld [vmem:[#allocation3 + $0x288] sm:$0xf] }
  0xbd   :  { %1937 = vmatpush.bf16.msrb.mxu1 %v3383_v42  ;;  %v4000_v42 = vld [vmem:[#allocation3 + $0x204] sm:$0xf]  ;;  %v4019_v36 = vld [vmem:[#allocation3 + $0x294] sm:$0xf0] }
  0xbe   :  { %1951 = vmatpush.bf16.msrb.mxu2 %v3511_v43  ;;  %v4493_v43 = vadd.f32 %v1052_v37, %v1039_v33  ;;  %v3431_v56 = vor.u32 %v4000_v42, %v3428_v45  ;;  %v4495_v24 = vpop.f32.mrf.mxu0  ;;  %v3643_v33 = vor.u32 %v4055_v20, %v3642_v19  ;;  %v3226_v45 = vld [vmem:[#allocation3 + $0x68] sm:$0xf]  ;;  %v4007_v20 = vld [vmem:[#allocation3 + $0x234] sm:$0xf0] }
  0xbf   :  { %1965 = vmatpush.bf16.msrb.mxu3 %v3639_v47  ;;  %v3556_v47 = vld [vmem:[#allocation3 + $0x310] sm:$0xf0]  ;;  %v4497_v12 = vpop.f32.mrf.mxu1  ;;  %v3450_v19 = vld [vmem:[#allocation3 + $0x228] sm:$0xf] }
  0xc0   :  { %1924 = vmatpush.bf16.msrb.mxu0 %v3239_v53  ;;  %v3546_v53 = vld [vmem:[#allocation3 + $0x2e8] sm:$0xf] }
  0xc1   :  { %1938 = vmatpush.bf16.msrb.mxu1 %v3367_v54  ;;  %v4031_v54 = vld [vmem:[#allocation3 + $0x2f4] sm:$0xf0]  ;;  %v4505_v37 = vpop.f32.mrf.mxu3 }
  0xc2   :  { %1952 = vmatpush.bf16.msrb.mxu2 %v3495_v55  ;;  %v3303_v55 = vor.u32 %v3968_v40, %v3300_v41  ;;  %v3547_v62 = vor.u32 %v4031_v54, %v3546_v53  ;;  %v4503_v32 = vpop.f32.mrf.mxu2  ;;  %v3243_v40 = vor.u32 %v3955_v30, %v3242_v29  ;;  %v3610_v54 = vld [vmem:[#allocation3 + $0x368] sm:$0xf] }
  0xc3   :  { %1966 = vmatpush.bf16.msrb.mxu3 %v3623_v59  ;;  %v3559_v59 = vor.u32 %v4032_v46, %v3556_v47  ;;  %v3951_v46 = vld [vmem:[#allocation3 + $0x74] sm:$0xf0]  ;;  %v3354_v47 = vld [vmem:[#allocation3 + $0x168] sm:$0xf] }
  0xc4   :  { %1925 = vmatpush.bf16.msrb.mxu0 %v3223_v1  ;;  %v3402_v1 = vld [vmem:[#allocation3 + $0x1c8] sm:$0xf] }
  0xc5   :  { %1939 = vmatpush.bf16.msrb.mxu1 %v3351_v2  ;;  %v3675_v2 = vor.u32 %v4063_v58, %v3674_v57  ;;  %v3355_v57 = vor.u32 %v3983_v50, %v3354_v47  ;;  %v3178_v30 = vld [vmem:[#allocation3 + $0x8] sm:$0xf]  ;;  %v3965_v47 = vld [vmem:[#allocation3 + $0xec] sm:$0xf] }
  0xc6   :  { %1953 = vmatpush.bf16.msrb.mxu2 %v3479_v3  ;;  %v3995_v3 = vld [vmem:[#allocation3 + $0x1d4] sm:$0xf0] }
  0xc7   :  { %1967 = vmatpush.bf16.msrb.mxu3 %v3607_v7  ;;  %v4059_v7 = vld [vmem:[#allocation3 + $0x3d4] sm:$0xf0]  ;;  %v3403_v8 = vor.u32 %v3995_v3, %v3402_v1  ;;  %v3466_v1 = vld [vmem:[#allocation3 + $0x248] sm:$0xf] }
  0xc8   :  { %1926 = vmatpush.bf16.msrb.mxu0 %v3207_v10  ;;  %v3959_v10 = vld [vmem:[#allocation3 + $0xb4] sm:$0xf0] }
  0xc9   :  { %1940 = vmatpush.bf16.msrb.mxu1 %v3335_v13  ;;  %v3659_v13 = vor.u32 %v4059_v7, %v3658_v6  ;;  %v4043_v6 = vld [vmem:[#allocation3 + $0x354] sm:$0xf0] }
  0xca   :  { %1954 = vmatpush.bf16.msrb.mxu2 %v3463_v14  ;;  %v3991_v14 = vld [vmem:[#allocation3 + $0x1b4] sm:$0xf0]  ;;  %v3595_v15 = vor.u32 %v4043_v6, %v3594_v4  ;;  %v3532_v4 = vld [vmem:[#allocation3 + $0x2d8] sm:$0xf0]  ;;  %v4057_v6 = vld [vmem:[#allocation3 + $0x3cc] sm:$0xf] }
  0xcb   :  { %1968 = vmatpush.bf16.msrb.mxu3 %v3591_v21  ;;  %v3259_v21 = vor.u32 %v3959_v10, %v3258_v9  ;;  %v3387_v26 = vor.u32 %v3991_v14, %v3386_v11  ;;  %v3194_v10 = vld [vmem:[#allocation3 + $0x28] sm:$0xf]  ;;  %v3943_v11 = vld [vmem:[#allocation3 + $0x34] sm:$0xf0] }
  0xcc   :  { %1927 = vmatpush.bf16.msrb.mxu0 %v3191_v34  ;;  %v3987_v34 = vld [vmem:[#allocation3 + $0x194] sm:$0xf0]  ;;  %v3195_v29 = vor.u32 %v3943_v11, %v3194_v10  ;;  %v3957_v10 = vld [vmem:[#allocation3 + $0xac] sm:$0xf]  ;;  %v3260_v11 = vld [vmem:[#allocation3 + $0xb8] sm:$0xf0] }
  0xcd   :  { %1941 = vmatpush.bf16.msrb.mxu1 %v3319_v38  ;;  %v3626_v38 = vld [vmem:[#allocation3 + $0x388] sm:$0xf]  ;;  %v3371_v42 = vor.u32 %v3987_v34, %v3370_v31  ;;  %v3939_v31 = vld [vmem:[#allocation3 + $0x14] sm:$0xf0]  ;;  %v3451_v34 = vor.u32 %v4007_v20, %v3450_v19  ;;  %v3516_v19 = vld [vmem:[#allocation3 + $0x2b8] sm:$0xf0] }
  0xce   :  { %1955 = vmatpush.bf16.msrb.mxu2 %v3447_v39  ;;  %v4051_v39 = vld [vmem:[#allocation3 + $0x394] sm:$0xf0]  ;;  %v3179_v50 = vor.u32 %v3939_v31, %v3178_v30  ;;  %v4053_v20 = vld [vmem:[#allocation3 + $0x3ac] sm:$0xf]  ;;  %v3244_v31 = vld [vmem:[#allocation3 + $0x98] sm:$0xf0] }
  0xcf   :  { %1969 = vmatpush.bf16.msrb.mxu3 %v3575_v44  ;;  %v3499_v44 = vor.u32 %v4019_v36, %v3498_v35  ;;  %v3627_v49 = vor.u32 %v4051_v39, %v3626_v38  ;;  %v3306_v35 = vld [vmem:[#allocation3 + $0x108] sm:$0xf]  ;;  %v3971_v36 = vld [vmem:[#allocation3 + $0x114] sm:$0xf0]  ;;  %v3953_v30 = vld [vmem:[#allocation3 + $0x8c] sm:$0xf] }
  0xd0   :  { %1928 = vmatpush.bf16.msrb.mxu0 %v3175_v51  ;;  %v1066_v41 = vpop.f32.mrf.mxu0  ;;  %v3482_v51 = vld [vmem:[#allocation3 + $0x268] sm:$0xf] }
  0xd1   :  { %1942 = vmatpush.bf16.msrb.mxu1 %v3303_v55  ;;  %v1080_v48 = vpop.f32.mrf.mxu1  ;;  %v4047_v55 = vld [vmem:[#allocation3 + $0x374] sm:$0xf0]  ;;  %v3483_v58 = vor.u32 %v4015_v52, %v3482_v51  ;;  %v3434_v38 = vld [vmem:[#allocation3 + $0x208] sm:$0xf]  ;;  %v3420_v51 = vld [vmem:[#allocation3 + $0x1f8] sm:$0xf0] }
  0xd2   :  { %1956 = vmatpush.bf16.msrb.mxu2 %v3431_v56  ;;  %v1081_v53 = vadd.f32 %v1080_v48, %v1066_v41  ;;  %v3227_v56 = vor.u32 %v3951_v46, %v3226_v45  ;;  %v3611_v63 = vor.u32 %v4047_v55, %v3610_v54  ;;  %v4003_v41 = vld [vmem:[#allocation3 + $0x214] sm:$0xf0]  ;;  %v3292_v48 = vld [vmem:[#allocation3 + $0xf8] sm:$0xf0]  ;;  %v4029_v52 = vld [vmem:[#allocation3 + $0x2ec] sm:$0xf]  ;;  %v3307_v55 = vor.u32 %v3971_v36, %v3306_v35 }
  0xd3   :  { %1970 = vmatpush.bf16.msrb.mxu3 %v3559_v59  ;;  %1929 = vmatmul.bf16.vlgmr.msrb.gmra.mxu0 %v4481_v18  ;;  %v3210_v59 = vld [vmem:[#allocation3 + $0x48] sm:$0xf]  ;;  %v3372_v35 = vld [vmem:[#allocation3 + $0x198] sm:$0xf0]  ;;  %v4017_v36 = vld [vmem:[#allocation3 + $0x28c] sm:$0xf] }
  0xd4   :  { %1977 = vmatpush.bf16.msra.mxu0 %v3291_v60  ;;  %1943 = vmatmul.bf16.vlgmr.msrb.gmra.mxu1 %v4485_v25  ;;  %v3947_v60 = vld [vmem:[#allocation3 + $0x54] sm:$0xf0] }
  0xd5   :  { %1991 = vmatpush.bf16.msra.mxu1 %v3419_v61  ;;  %1957 = vmatmul.bf16.vlgmr.msrb.gmra.mxu2 %v4483_v22  ;;  %v3338_v61 = vld [vmem:[#allocation3 + $0x148] sm:$0xf]  ;;  %v3211_v7 = vor.u32 %v3947_v60, %v3210_v59  ;;  %v3295_v60 = vor.u32 %v3965_v47, %v3292_v48  ;;  %v3228_v47 = vld [vmem:[#allocation3 + $0x78] sm:$0xf0]  ;;  %v3981_v48 = vld [vmem:[#allocation3 + $0x16c] sm:$0xf] }
  0xd6   :  { %2005 = vmatpush.bf16.msra.mxu2 %v3547_v62  ;;  %1971 = vmatmul.bf16.vlgmr.msrb.gmra.mxu3 %v4487_v28 }
  0xd7   :  { %2019 = vmatpush.bf16.msra.mxu3 %v3675_v2  ;;  %v4011_v2 = vld [vmem:[#allocation3 + $0x254] sm:$0xf0] }
  0xd8   :  { %1978 = vmatpush.bf16.msra.mxu0 %v3275_v5  ;;  %v1094_v62 = vpop.f32.mrf.mxu2  ;;  %v3467_v9 = vor.u32 %v4011_v2, %v3466_v1  ;;  %v3993_v1 = vld [vmem:[#allocation3 + $0x1cc] sm:$0xf] }
  0xd9   :  { %1992 = vmatpush.bf16.msra.mxu1 %v3403_v8  ;;  %v1095_v3 = vadd.f32 %v1094_v62, %v1081_v53  ;;  %v1108_v23 = vpop.f32.mrf.mxu3  ;;  %v1068_v8 = vpop.f32.mrf.mxu0  ;;  %v3548_v53 = vld [vmem:[#allocation3 + $0x2f8] sm:$0xf0] }
  0xda   :  { %2006 = vmatpush.bf16.msra.mxu2 %v3531_v17  ;;  %v3339_v17 = vor.u32 %v3979_v0, %v3338_v61  ;;  %v1082_v14 = vpop.f32.mrf.mxu1  ;;  %v3551_v62 = vor.u32 %v4029_v52, %v3548_v53  ;;  %v3276_v0 = vld [vmem:[#allocation3 + $0xd8] sm:$0xf0]  ;;  %v4013_v52 = vld [vmem:[#allocation3 + $0x26c] sm:$0xf] }
  0xdb   :  { %2020 = vmatpush.bf16.msra.mxu3 %v3659_v13  ;;  %v4507_v5 = vadd.f32 %v1108_v23, %v1095_v3  ;;  %v3322_v13 = vld [vmem:[#allocation3 + $0x128] sm:$0xf]  ;;  %v3404_v3 = vld [vmem:[#allocation3 + $0x1d8] sm:$0xf0]  ;;  %v4025_v23 = vld [vmem:[#allocation3 + $0x2cc] sm:$0xf] }
  0xdc   :  { %1979 = vmatpush.bf16.msra.mxu0 %v3259_v21  ;;  %v1083_v21 = vadd.f32 %v1082_v14, %v1068_v8  ;;  %v3484_v53 = vld [vmem:[#allocation3 + $0x278] sm:$0xf0] }
  0xdd   :  { %1993 = vmatpush.bf16.msra.mxu1 %v3387_v26  ;;  %v3578_v26 = vld [vmem:[#allocation3 + $0x328] sm:$0xf] }
  0xde   :  { %2007 = vmatpush.bf16.msra.mxu2 %v3515_v27  ;;  %v4039_v27 = vld [vmem:[#allocation3 + $0x334] sm:$0xf0] }
  0xdf   :  { %2021 = vmatpush.bf16.msra.mxu3 %v3643_v33  ;;  %v3323_v33 = vor.u32 %v3975_v16, %v3322_v13  ;;  %v3989_v13 = vld [vmem:[#allocation3 + $0x1ac] sm:$0xf] }
  0xe0   :  { %1980 = vmatpush.bf16.msra.mxu0 %v3243_v40  ;;  %v1096_v39 = vpop.f32.mrf.mxu2  ;;  %v3579_v40 = vor.u32 %v4039_v27, %v3578_v26  ;;  %v4021_v16 = vld [vmem:[#allocation3 + $0x2ac] sm:$0xf]  ;;  %v3263_v26 = vor.u32 %v3957_v10, %v3260_v11 }
  0xe1   :  { %1994 = vmatpush.bf16.msra.mxu1 %v3371_v42  ;;  %v3562_v42 = vld [vmem:[#allocation3 + $0x308] sm:$0xf]  ;;  %v1097_v45 = vadd.f32 %v1096_v39, %v1083_v21  ;;  %v1110_v46 = vpop.f32.mrf.mxu3  ;;  %v3644_v21 = vld [vmem:[#allocation3 + $0x3b8] sm:$0xf0]  ;;  %v4049_v39 = vld [vmem:[#allocation3 + $0x38c] sm:$0xf] }
  0xe2   :  { %2008 = vmatpush.bf16.msra.mxu2 %v3499_v44  ;;  %v4035_v44 = vld [vmem:[#allocation3 + $0x314] sm:$0xf0] }
  0xe3   :  { %2022 = vmatpush.bf16.msra.mxu3 %v3627_v49  ;;  %v3997_v49 = vld [vmem:[#allocation3 + $0x1ec] sm:$0xf]  ;;  %v4509_v54 = vadd.f32 %v1110_v46, %v1097_v45  ;;  %v3563_v59 = vor.u32 %v4035_v44, %v3562_v42 }
  0xe4   :  { %1981 = vmatpush.bf16.msra.mxu0 %v3227_v56  ;;  %v3435_v56 = vor.u32 %v4003_v41, %v3434_v38  ;;  %v3423_v61 = vor.u32 %v3997_v49, %v3420_v51  ;;  %v3500_v38 = vld [vmem:[#allocation3 + $0x298] sm:$0xf0]  ;;  %v3247_v41 = vor.u32 %v3953_v30, %v3244_v31  ;;  %v3949_v46 = vld [vmem:[#allocation3 + $0x6c] sm:$0xf] }
  0xe5   :  { %1995 = vmatpush.bf16.msra.mxu1 %v3355_v57  ;;  %v4061_v57 = vld [vmem:[#allocation3 + $0x3ec] sm:$0xf]  ;;  %v3503_v45 = vor.u32 %v4017_v36, %v3500_v38  ;;  %v3356_v51 = vld [vmem:[#allocation3 + $0x178] sm:$0xf0] }
  0xe6   :  { %2009 = vmatpush.bf16.msra.mxu2 %v3483_v58  ;;  %v3676_v58 = vld [vmem:[#allocation3 + $0x3f8] sm:$0xf0]  ;;  %v4037_v30 = vld [vmem:[#allocation3 + $0x32c] sm:$0xf] }
  0xe7   :  { %2023 = vmatpush.bf16.msra.mxu3 %v3611_v63  ;;  %v3961_v63 = vld [vmem:[#allocation3 + $0xcc] sm:$0xf]  ;;  %v3679_v2 = vor.u32 %v4061_v57, %v3676_v58  ;;  %v3612_v57 = vld [vmem:[#allocation3 + $0x378] sm:$0xf0]  ;;  %v3231_v58 = vor.u32 %v3949_v46, %v3228_v47 }
  0xe8   :  { %1982 = vmatpush.bf16.msra.mxu0 %v3211_v7  ;;  %v3660_v7 = vld [vmem:[#allocation3 + $0x3d8] sm:$0xf0]  ;;  %v3279_v8 = vor.u32 %v3961_v63, %v3276_v0  ;;  %v3977_v63 = vld [vmem:[#allocation3 + $0x14c] sm:$0xf] }
  0xe9   :  { %1996 = vmatpush.bf16.msra.mxu1 %v3339_v17  ;;  %v3407_v17 = vor.u32 %v3993_v1, %v3404_v3  ;;  %v3663_v14 = vor.u32 %v4057_v6, %v3660_v7  ;;  %v4009_v3 = vld [vmem:[#allocation3 + $0x24c] sm:$0xf]  ;;  %v3580_v31 = vld [vmem:[#allocation3 + $0x338] sm:$0xf0] }
  0xea   :  { %2010 = vmatpush.bf16.msra.mxu2 %v3467_v9  ;;  %v3535_v9 = vor.u32 %v4025_v23, %v3532_v4  ;;  %v3468_v23 = vld [vmem:[#allocation3 + $0x258] sm:$0xf0]  ;;  %v4041_v7 = vld [vmem:[#allocation3 + $0x34c] sm:$0xf] }
  0xeb   :  { %2024 = vmatpush.bf16.msra.mxu3 %v3595_v15  ;;  %v3388_v15 = vld [vmem:[#allocation3 + $0x1b8] sm:$0xf0]  ;;  %v4033_v46 = vld [vmem:[#allocation3 + $0x30c] sm:$0xf] }
  0xec   :  { %1983 = vmatpush.bf16.msra.mxu0 %v3195_v29  ;;  %v3391_v27 = vor.u32 %v3989_v13, %v3388_v15  ;;  %v3519_v29 = vor.u32 %v4021_v16, %v3516_v19  ;;  %v3471_v13 = vor.u32 %v4009_v3, %v3468_v23  ;;  %v3196_v15 = vld [vmem:[#allocation3 + $0x38] sm:$0xf0]  ;;  %v3973_v16 = vld [vmem:[#allocation3 + $0x12c] sm:$0xf] }
  0xed   :  { %1997 = vmatpush.bf16.msra.mxu1 %v3323_v33  ;;  %v3985_v33 = vld [vmem:[#allocation3 + $0x18c] sm:$0xf]  ;;  %v3180_v38 = vld [vmem:[#allocation3 + $0x18] sm:$0xf0] }
  0xee   :  { %2011 = vmatpush.bf16.msra.mxu2 %v3451_v34  ;;  %v3647_v34 = vor.u32 %v4053_v20, %v3644_v21  ;;  %v3375_v44 = vor.u32 %v3985_v33, %v3372_v35  ;;  %v3324_v21 = vld [vmem:[#allocation3 + $0x138] sm:$0xf0] }
  0xef   :  { %2025 = vmatpush.bf16.msra.mxu3 %v3579_v40  ;;  %v3628_v40 = vld [vmem:[#allocation3 + $0x398] sm:$0xf0]  ;;  %v3327_v35 = vor.u32 %v3973_v16, %v3324_v21  ;;  %v4223_v16 = vld [vmem:[#allocation7 + $0xf4] sm:$0xf0]  ;;  %v3690_v21 = vld [vmem:[#allocation7 + $0x10] sm:$0xf] }
  0xf0   :  { %1984 = vmatpush.bf16.msra.mxu0 %v3179_v50  ;;  %v1122_v42 = vpop.f32.mrf.mxu0  ;;  %v3631_v50 = vor.u32 %v4049_v39, %v3628_v40  ;;  %v3969_v39 = vld [vmem:[#allocation3 + $0x10c] sm:$0xf]  ;;  %v3308_v40 = vld [vmem:[#allocation3 + $0x118] sm:$0xf0] }
  0xf1   :  { %1998 = vmatpush.bf16.msra.mxu1 %v3307_v55  ;;  %v1136_v49 = vpop.f32.mrf.mxu1 }
  0xf2   :  { %2012 = vmatpush.bf16.msra.mxu2 %v3435_v56  ;;  %v1137_v55 = vadd.f32 %v1136_v49, %v1122_v42  ;;  %v4045_v56 = vld [vmem:[#allocation3 + $0x36c] sm:$0xf]  ;;  %v3583_v42 = vor.u32 %v4037_v30, %v3580_v31  ;;  %v3564_v49 = vld [vmem:[#allocation3 + $0x318] sm:$0xf0]  ;;  %v3794_v30 = vld [vmem:[#allocation7 + $0xe0] sm:$0xf] }
  0xf3   :  { %2026 = vmatpush.bf16.msra.mxu3 %v3563_v59  ;;  %1985 = vmatmul.bf16.vlgmr.msra.gmra.mxu0 %v4481_v18  ;;  %v3359_v59 = vor.u32 %v3981_v48, %v3356_v51  ;;  %v3615_v1 = vor.u32 %v4045_v56, %v3612_v57  ;;  %v4207_v51 = vld [vmem:[#allocation7 + $0x74] sm:$0xf0]  ;;  %v3567_v57 = vor.u32 %v4033_v46, %v3564_v49  ;;  %v4221_v31 = vld [vmem:[#allocation7 + $0xe4] sm:$0xf0]  ;;  %v4204_v49 = vld [vmem:[#allocation7 + $0x64] sm:$0xf] }
  0xf4   :  { %2033 = vmatpush.bf16.msrb.mxu0 %v3295_v60  ;;  %1999 = vmatmul.bf16.vlgmr.msra.gmra.mxu1 %v4485_v25  ;;  %v3487_v60 = vor.u32 %v4013_v52, %v3484_v53 }
  0xf5   :  { %2047 = vmatpush.bf16.msrb.mxu1 %v3423_v61  ;;  %2013 = vmatmul.bf16.vlgmr.msra.gmra.mxu2 %v4483_v22  ;;  %v3945_v61 = vld [vmem:[#allocation3 + $0x4c] sm:$0xf] }
  0xf6   :  { %2061 = vmatpush.bf16.msrb.mxu2 %v3551_v62  ;;  %2027 = vmatmul.bf16.vlgmr.msra.gmra.mxu3 %v4487_v28  ;;  %v3212_v62 = vld [vmem:[#allocation3 + $0x58] sm:$0xf0] }
  0xf7   :  { %2075 = vmatpush.bf16.msrb.mxu3 %v3679_v2  ;;  %v3340_v2 = vld [vmem:[#allocation3 + $0x158] sm:$0xf0] }
  0xf8   :  { %2034 = vmatpush.bf16.msrb.mxu0 %v3279_v8  ;;  %v1150_v0 = vpop.f32.mrf.mxu2  ;;  %v3596_v8 = vld [vmem:[#allocation3 + $0x358] sm:$0xf0]  ;;  %v1124_v10 = vpop.f32.mrf.mxu0  ;;  %v3343_v11 = vor.u32 %v3977_v63, %v3340_v2  ;;  %v4203_v63 = vld [vmem:[#allocation7 + $0x54] sm:$0xf0]  ;;  %v4201_v2 = vld [vmem:[#allocation7 + $0x44] sm:$0xf0] }
  0xf9   :  { %2048 = vmatpush.bf16.msrb.mxu1 %v3407_v17  ;;  %v1151_v4 = vadd.f32 %v1150_v0, %v1137_v55  ;;  %v1164_v6 = vpop.f32.mrf.mxu3  ;;  %v3215_v17 = vor.u32 %v3945_v61, %v3212_v62  ;;  %v1138_v19 = vpop.f32.mrf.mxu1  ;;  %v3599_v20 = vor.u32 %v4041_v7, %v3596_v8  ;;  %v3311_v55 = vor.u32 %v3969_v39, %v3308_v40  ;;  %v3722_v62 = vld [vmem:[#allocation7 + $0x50] sm:$0xf]  ;;  %v4199_v8 = vld [vmem:[#allocation7 + $0x34] sm:$0xf0]  ;;  %v3740_v39 = vld [vmem:[#allocation7 + $0x78] sm:$0xf0] }
  0xfa   :  { %2062 = vmatpush.bf16.msrb.mxu2 %v3535_v9  ;;  %v3723_v0 = vor.u32 %v4203_v63, %v3722_v62  ;;  %v3706_v7 = vld [vmem:[#allocation7 + $0x30] sm:$0xf]  ;;  %v4200_v63 = vld [vmem:[#allocation7 + $0x44] sm:$0xf] }
  0xfb   :  { %2076 = vmatpush.bf16.msrb.mxu3 %v3663_v14  ;;  %v4515_v9 = vadd.f32 %v1164_v6, %v1151_v4  ;;  %v3941_v14 = vld [vmem:[#allocation3 + $0x2c] sm:$0xf] }
  0xfc   :  { %2035 = vmatpush.bf16.msrb.mxu0 %v3263_v26  ;;  %v4005_v26 = vld [vmem:[#allocation3 + $0x22c] sm:$0xf]  ;;  %v3199_v33 = vor.u32 %v3941_v14, %v3196_v15  ;;  %v3802_v15 = vld [vmem:[#allocation7 + $0xf0] sm:$0xf] }
  0xfd   :  { %2049 = vmatpush.bf16.msrb.mxu1 %v3391_v27  ;;  %v3452_v27 = vld [vmem:[#allocation3 + $0x238] sm:$0xf0] }
  0xfe   :  { %2063 = vmatpush.bf16.msrb.mxu2 %v3519_v29  ;;  %v1139_v29 = vadd.f32 %v1138_v19, %v1124_v10  ;;  %v3455_v36 = vor.u32 %v4005_v26, %v3452_v27  ;;  %v4197_v10 = vld [vmem:[#allocation7 + $0x24] sm:$0xf0]  ;;  %v4195_v26 = vld [vmem:[#allocation7 + $0x14] sm:$0xf0]  ;;  %v3803_v27 = vor.u32 %v4223_v16, %v3802_v15 }
  0xff   :  { %2077 = vmatpush.bf16.msrb.mxu3 %v3647_v34  ;;  %v3937_v34 = vld [vmem:[#allocation3 + $0xc] sm:$0xf]  ;;  %v4209_v15 = vld [vmem:[#allocation7 + $0x84] sm:$0xf0] }
 0x100   :  { %2036 = vmatpush.bf16.msrb.mxu0 %v3247_v41  ;;  %v1152_v41 = vpop.f32.mrf.mxu2  ;;  %v3183_v52 = vor.u32 %v3937_v34, %v3180_v38  ;;  %v4193_v34 = vld [vmem:[#allocation7 + $0x4] sm:$0xf0]  ;;  %v4206_v38 = vld [vmem:[#allocation7 + $0x74] sm:$0xf] }
 0x101   :  { %2050 = vmatpush.bf16.msrb.mxu1 %v3375_v44  ;;  %v4001_v44 = vld [vmem:[#allocation3 + $0x20c] sm:$0xf]  ;;  %v1153_v47 = vadd.f32 %v1152_v41, %v1139_v29  ;;  %v1166_v48 = vpop.f32.mrf.mxu3  ;;  %v3691_v29 = vor.u32 %v4195_v26, %v3690_v21 }
 0x102   :  { %2064 = vmatpush.bf16.msrb.mxu2 %v3503_v45  ;;  %v3436_v45 = vld [vmem:[#allocation3 + $0x218] sm:$0xf0] }
 0x103   :  { %2078 = vmatpush.bf16.msrb.mxu3 %v3631_v50  ;;  %v3738_v50 = vld [vmem:[#allocation7 + $0x70] sm:$0xf]  ;;  %v4517_v53 = vadd.f32 %v1166_v48, %v1153_v47  ;;  %v3439_v56 = vor.u32 %v4001_v44, %v3436_v45  ;;  %v4219_v45 = vld [vmem:[#allocation7 + $0xd4] sm:$0xf0]  ;;  %v3743_v47 = vor.u32 %v4206_v38, %v3740_v39 }
 0x104   :  { %2037 = vmatpush.bf16.msrb.mxu0 %v3231_v58  ;;  %v3739_v58 = vor.u32 %v4207_v51, %v3738_v50  ;;  %v3786_v44 = vld [vmem:[#allocation7 + $0xd0] sm:$0xf]  ;;  %v3732_v50 = vld [vmem:[#allocation7 + $0x68] sm:$0xf0]  ;;  %v3778_v51 = vld [vmem:[#allocation7 + $0xc0] sm:$0xf] }
 0x105   :  { %2051 = vmatpush.bf16.msrb.mxu1 %v3359_v59  ;;  %v3730_v59 = vld [vmem:[#allocation7 + $0x60] sm:$0xf]  ;;  %v3787_v48 = vor.u32 %v4219_v45, %v3786_v44  ;;  %v4237_v44 = vld [vmem:[#allocation7 + $0x164] sm:$0xf0]  ;;  %v4220_v45 = vld [vmem:[#allocation7 + $0xe4] sm:$0xf] }
 0x106   :  { %2065 = vmatpush.bf16.msrb.mxu2 %v3487_v60  ;;  %v4205_v60 = vld [vmem:[#allocation7 + $0x64] sm:$0xf0] }
 0x107   :  { %2079 = vmatpush.bf16.msrb.mxu3 %v3615_v1  ;;  %v3731_v61 = vor.u32 %v4205_v60, %v3730_v59  ;;  %v3714_v1 = vld [vmem:[#allocation7 + $0x40] sm:$0xf]  ;;  %v3770_v59 = vld [vmem:[#allocation7 + $0xb0] sm:$0xf]  ;;  %v4215_v60 = vld [vmem:[#allocation7 + $0xb4] sm:$0xf0] }
 0x108   :  { %2038 = vmatpush.bf16.msrb.mxu0 %v3215_v17  ;;  %v3715_v4 = vor.u32 %v4201_v2, %v3714_v1  ;;  %v3698_v17 = vld [vmem:[#allocation7 + $0x20] sm:$0xf]  ;;  %v4213_v2 = vld [vmem:[#allocation7 + $0xa4] sm:$0xf0] }
 0x109   :  { %2052 = vmatpush.bf16.msrb.mxu1 %v3343_v11  ;;  %v3699_v14 = vor.u32 %v4197_v10, %v3698_v17  ;;  %v3762_v1 = vld [vmem:[#allocation7 + $0xa0] sm:$0xf]  ;;  %v3754_v17 = vld [vmem:[#allocation7 + $0x90] sm:$0xf]  ;;  %v4211_v10 = vld [vmem:[#allocation7 + $0x94] sm:$0xf0] }
 0x10a   :  { %2066 = vmatpush.bf16.msrb.mxu2 %v3471_v13 }
 0x10b   :  { %2080 = vmatpush.bf16.msrb.mxu3 %v3599_v20 }
 0x10c   :  { %2039 = vmatpush.bf16.msrb.mxu0 %v3199_v33  ;;  %v3682_v33 = vld [vmem:[#allocation7] sm:$0xf] }
 0x10d   :  { %2053 = vmatpush.bf16.msrb.mxu1 %v3327_v35  ;;  %v3795_v35 = vor.u32 %v4221_v31, %v3794_v30  ;;  %v3692_v30 = vld [vmem:[#allocation7 + $0x18] sm:$0xf0]  ;;  %v3866_v31 = vld [vmem:[#allocation7 + $0x170] sm:$0xf] }
 0x10e   :  { %2067 = vmatpush.bf16.msrb.mxu2 %v3455_v36 }
 0x10f   :  { %2081 = vmatpush.bf16.msrb.mxu3 %v3583_v42  ;;  %v3683_v42 = vor.u32 %v4193_v34, %v3682_v33  ;;  %v4222_v33 = vld [vmem:[#allocation7 + $0xf4] sm:$0xf]  ;;  %v3804_v34 = vld [vmem:[#allocation7 + $0xf8] sm:$0xf0] }
 0x110   :  { %2040 = vmatpush.bf16.msrb.mxu0 %v3183_v52  ;;  %v1178_v3 = vpop.f32.mrf.mxu0  ;;  %v4217_v52 = vld [vmem:[#allocation7 + $0xc4] sm:$0xf0]  ;;  %v3807_v39 = vor.u32 %v4222_v33, %v3804_v34  ;;  %v4210_v33 = vld [vmem:[#allocation7 + $0x94] sm:$0xf] }
 0x111   :  { %2054 = vmatpush.bf16.msrb.mxu1 %v3311_v55  ;;  %v1192_v23 = vpop.f32.mrf.mxu1  ;;  %v3735_v55 = vor.u32 %v4204_v49, %v3732_v50  ;;  %v3796_v50 = vld [vmem:[#allocation7 + $0xe8] sm:$0xf0] }
 0x112   :  { %2068 = vmatpush.bf16.msrb.mxu2 %v3439_v56  ;;  %v1193_v6 = vadd.f32 %v1192_v23, %v1178_v3  ;;  %v3779_v56 = vor.u32 %v4217_v52, %v3778_v51  ;;  %v1027_v3 = vadd.f32 %v4497_v12, %v4495_v24  ;;  %v3746_v12 = vld [vmem:[#allocation7 + $0x80] sm:$0xf] }
 0x113   :  { %2082 = vmatpush.bf16.msrb.mxu3 %v3567_v57  ;;  %2041 = vmatmul.bf16.vlgmr.msrb.gmra.mxu0 %v4481_v18  ;;  %v3707_v18 = vor.u32 %v4199_v8, %v3706_v7  ;;  %v4202_v57 = vld [vmem:[#allocation7 + $0x54] sm:$0xf]  ;;  %v3763_v7 = vor.u32 %v4213_v2, %v3762_v1  ;;  %v3788_v1 = vld [vmem:[#allocation7 + $0xd8] sm:$0xf0] }
 0x114   :  { %2509 = vmatpush.bf16.msra.mxu0 %v3739_v58  ;;  %2055 = vmatmul.bf16.vlgmr.msrb.gmra.mxu1 %v4485_v25  ;;  %v3724_v58 = vld [vmem:[#allocation7 + $0x58] sm:$0xf0] }
 0x115   :  { %2069 = vmatmul.bf16.vlgmr.msrb.gmra.mxu2 %v4483_v22  ;;  %2523 = vmatpush.bf16.msra.mxu1 %v3803_v27  ;;  %v3727_v62 = vor.u32 %v4202_v57, %v3724_v58 }
 0x116   :  { %2083 = vmatmul.bf16.vlgmr.msrb.gmra.mxu3 %v4487_v28 }
 0x118   :  { %2510 = vmatpush.bf16.msra.mxu0 %v3731_v61  ;;  %v1206_v25 = vpop.f32.mrf.mxu2  ;;  %v1180_v13 = vpop.f32.mrf.mxu0  ;;  %v3771_v61 = vor.u32 %v4215_v60, %v3770_v59 }
 0x119   :  { %v1207_v11 = vadd.f32 %v1206_v25, %v1193_v6  ;;  %v1220_v22 = vpop.f32.mrf.mxu3  ;;  %v1194_v28 = vpop.f32.mrf.mxu1  ;;  %2524 = vmatpush.bf16.msra.mxu1 %v3795_v35  ;;  %v4198_v6 = vld [vmem:[#allocation7 + $0x34] sm:$0xf]  ;;  %v3755_v25 = vor.u32 %v4211_v10, %v3754_v17  ;;  %v3780_v17 = vld [vmem:[#allocation7 + $0xc8] sm:$0xf0] }
 0x11a   :  { %v1195_v20 = vadd.f32 %v1194_v28, %v1180_v13  ;;  %v4196_v28 = vld [vmem:[#allocation7 + $0x24] sm:$0xf] }
 0x11b   :  { %v4523_v19 = vadd.f32 %v1220_v22, %v1207_v11  ;;  %v1041_v11 = vadd.f32 %v4503_v32, %v1027_v3  ;;  %v3747_v32 = vor.u32 %v4209_v15, %v3746_v12  ;;  %v3772_v12 = vld [vmem:[#allocation7 + $0xb8] sm:$0xf0] }
 0x11c   :  { %2511 = vmatpush.bf16.msra.mxu0 %v3723_v0  ;;  %v3716_v0 = vld [vmem:[#allocation7 + $0x48] sm:$0xf0] }
 0x11d   :  { %2525 = vmatpush.bf16.msra.mxu1 %v3787_v48  ;;  %v1055_v16 = vadd.f32 %v4505_v37, %v1041_v11  ;;  %v4535_v37 = vld [vmem:[%s4563_s4] sm:$0xf]  ;;  %v3684_v48 = vld [vmem:[#allocation7 + $0x8] sm:$0xf0] }
 0x11e   :  { %v2091_v52 = vperm.slane %v4535_v37, 0 }
 0x120   :  { %2512 = vmatpush.bf16.msra.mxu0 %v3715_v4  ;;  %v1208_v36 = vpop.f32.mrf.mxu2  ;;  %v3719_v4 = vor.u32 %v4200_v63, %v3716_v0  ;;  %v4218_v63 = vld [vmem:[#allocation7 + $0xd4] sm:$0xf] }
 0x121   :  { %v1209_v40 = vadd.f32 %v1208_v36, %v1195_v20  ;;  %v1222_v41 = vpop.f32.mrf.mxu3  ;;  %2526 = vmatpush.bf16.msra.mxu1 %v3779_v56  ;;  %v3799_v56 = vor.u32 %v4220_v45, %v3796_v50  ;;  %v3748_v45 = vld [vmem:[#allocation7 + $0x88] sm:$0xf0] }
 0x123   :  { %v4525_v46 = vadd.f32 %v1222_v41, %v1209_v40 }
 0x124   :  { %2513 = vmatpush.bf16.msra.mxu0 %v3707_v18  ;;  %v3708_v18 = vld [vmem:[#allocation7 + $0x38] sm:$0xf0] }
 0x125   :  { %2527 = vmatpush.bf16.msra.mxu1 %v3771_v61  ;;  %v3711_v13 = vor.u32 %v4198_v6, %v3708_v18  ;;  %v3850_v61 = vld [vmem:[#allocation7 + $0x150] sm:$0xf]  ;;  %v3842_v6 = vld [vmem:[#allocation7 + $0x140] sm:$0xf] }
 0x128   :  { %2514 = vmatpush.bf16.msra.mxu0 %v3699_v14  ;;  %v3700_v14 = vld [vmem:[#allocation7 + $0x28] sm:$0xf0] }
 0x129   :  { %2528 = vmatpush.bf16.msra.mxu1 %v3763_v7  ;;  %v3703_v27 = vor.u32 %v4196_v28, %v3700_v14  ;;  %v4233_v7 = vld [vmem:[#allocation7 + $0x144] sm:$0xf0]  ;;  %v4231_v28 = vld [vmem:[#allocation7 + $0x134] sm:$0xf0]  ;;  %v4214_v14 = vld [vmem:[#allocation7 + $0xb4] sm:$0xf] }
 0x12a   :  { %v3843_v18 = vor.u32 %v4233_v7, %v3842_v6  ;;  %v3775_v15 = vor.u32 %v4214_v14, %v3772_v12  ;;  %v4251_v7 = vld [vmem:[#allocation7 + $0x1d4] sm:$0xf0]  ;;  %v4249_v14 = vld [vmem:[#allocation7 + $0x1c4] sm:$0xf0] }
 0x12c   :  { %2515 = vmatpush.bf16.msra.mxu0 %v3691_v29  ;;  %v4194_v29 = vld [vmem:[#allocation7 + $0x14] sm:$0xf] }
 0x12d   :  { %2529 = vmatpush.bf16.msra.mxu1 %v3755_v25  ;;  %v3695_v41 = vor.u32 %v4194_v29, %v3692_v30 }
 0x130   :  { %2516 = vmatpush.bf16.msra.mxu0 %v3683_v42  ;;  %v1874_v23 = vpop.f32.mrf.mxu0  ;;  %v3858_v42 = vld [vmem:[#allocation7 + $0x160] sm:$0xf] }
 0x131   :  { %v1888_v8 = vpop.f32.mrf.mxu1  ;;  %v1875_v22 = vadd.f32 %v1874_v23, %v4493_v43  ;;  %v4239_v43 = vld [vmem:[#allocation7 + $0x174] sm:$0xf0]  ;;  %2530 = vmatpush.bf16.msra.mxu1 %v3747_v32  ;;  %v3859_v49 = vor.u32 %v4237_v44, %v3858_v42  ;;  %v3791_v23 = vor.u32 %v4218_v63, %v3788_v1  ;;  %v4236_v63 = vld [vmem:[#allocation7 + $0x164] sm:$0xf]  ;;  %v3860_v1 = vld [vmem:[#allocation7 + $0x168] sm:$0xf0] }
 0x132   :  { %v3867_v38 = vor.u32 %v4239_v43, %v3866_v31  ;;  %v3818_v31 = vld [vmem:[#allocation7 + $0x110] sm:$0xf]  ;;  %v4227_v43 = vld [vmem:[#allocation7 + $0x114] sm:$0xf0] }
 0x133   :  { %v1889_v20 = vadd.f32 %v1888_v8, %v1875_v22  ;;  %v4216_v8 = vld [vmem:[#allocation7 + $0xc4] sm:$0xf]  ;;  %v3819_v34 = vor.u32 %v4227_v43, %v3818_v31  ;;  %v3836_v43 = vld [vmem:[#allocation7 + $0x138] sm:$0xf0] }
 0x134   :  { %2565 = vmatpush.bf16.msrb.mxu0 %v3743_v47  ;;  %2537 = vmatpush.bf16.msra.mxu2 %v3867_v38  ;;  %v4192_v47 = vld [vmem:[#allocation7 + $0x4] sm:$0xf]  ;;  %v3783_v11 = vor.u32 %v4216_v8, %v3780_v17  ;;  %v4234_v8 = vld [vmem:[#allocation7 + $0x154] sm:$0xf] }
 0x135   :  { %2579 = vmatpush.bf16.msrb.mxu1 %v3807_v39  ;;  %v3687_v60 = vor.u32 %v4192_v47, %v3684_v48  ;;  %v3810_v39 = vld [vmem:[#allocation7 + $0x100] sm:$0xf]  ;;  %v3930_v47 = vld [vmem:[#allocation7 + $0x1f0] sm:$0xf]  ;;  %v4255_v48 = vld [vmem:[#allocation7 + $0x1f4] sm:$0xf0] }
 0x138   :  { %2566 = vmatpush.bf16.msrb.mxu0 %v3735_v55  ;;  %v1902_v24 = vpop.f32.mrf.mxu2  ;;  %v1876_v21 = vpop.f32.mrf.mxu0  ;;  %2538 = vmatpush.bf16.msra.mxu2 %v3859_v49 }
 0x139   :  { %v1916_v26 = vpop.f32.mrf.mxu3  ;;  %v1903_v35 = vadd.f32 %v1902_v24, %v1889_v20  ;;  %v1877_v36 = vadd.f32 %v1876_v21, %v1055_v16  ;;  %v1890_v40 = vpop.f32.mrf.mxu1  ;;  %2580 = vmatpush.bf16.msrb.mxu1 %v3799_v56  ;;  %v3826_v16 = vld [vmem:[#allocation7 + $0x120] sm:$0xf]  ;;  %v4229_v20 = vld [vmem:[#allocation7 + $0x124] sm:$0xf0]  ;;  %v4212_v21 = vld [vmem:[#allocation7 + $0xa4] sm:$0xf] }
 0x13a   :  { %v4238_v56 = vld [vmem:[#allocation7 + $0x174] sm:$0xf] }
 0x13b   :  { %v1917_v51 = vadd.f32 %v1916_v26, %v1903_v35  ;;  %v1891_v55 = vadd.f32 %v1890_v40, %v1877_v36  ;;  %v3827_v26 = vor.u32 %v4229_v20, %v3826_v16  ;;  %v3756_v35 = vld [vmem:[#allocation7 + $0x98] sm:$0xf0]  ;;  %v4225_v40 = vld [vmem:[#allocation7 + $0x104] sm:$0xf0]  ;;  %v3844_v16 = vld [vmem:[#allocation7 + $0x148] sm:$0xf0] }
 0x13c   :  { %2567 = vmatpush.bf16.msrb.mxu0 %v3727_v62  ;;  %v4235_v62 = vld [vmem:[#allocation7 + $0x154] sm:$0xf0]  ;;  %v3759_v36 = vor.u32 %v4210_v33, %v3756_v35  ;;  %v3811_v44 = vor.u32 %v4225_v40, %v3810_v39  ;;  %v4245_v35 = vld [vmem:[#allocation7 + $0x1a4] sm:$0xf0]  ;;  %v3828_v39 = vld [vmem:[#allocation7 + $0x128] sm:$0xf0] }
 0x13d   :  { %v3851_v0 = vor.u32 %v4235_v62, %v3850_v61  ;;  %v2099_v2 = vadd.f32 %v2091_v52, %v1917_v51  ;;  %2581 = vmatpush.bf16.msrb.mxu1 %v3791_v23  ;;  %v3922_v61 = vld [vmem:[#allocation7 + $0x1e0] sm:$0xf]  ;;  %v4253_v62 = vld [vmem:[#allocation7 + $0x1e4] sm:$0xf0]  ;;  %v2092_v23 = vperm.slane %v4535_v37, 1 }
 0x13f   :  { %2539 = vmatpush.bf16.msra.mxu2 %v3851_v0  ;;  %v2107_v10 = vmax.f32 %v2099_v2, 0.0  ;;  %v3923_v0 = vor.u32 %v4253_v62, %v3922_v61  ;;  %v3863_v2 = vor.u32 %v4236_v63, %v3860_v1 }
 0x140   :  { %2568 = vmatpush.bf16.msrb.mxu0 %v3719_v4  ;;  %v1904_v57 = vpop.f32.mrf.mxu2 }
 0x141   :  { %v1905_v58 = vadd.f32 %v1904_v57, %v1891_v55  ;;  %v1918_v59 = vpop.f32.mrf.mxu3  ;;  %2582 = vmatpush.bf16.msrb.mxu1 %v3783_v11  ;;  %v3931_v55 = vor.u32 %v4255_v48, %v3930_v47  ;;  %v3868_v57 = vld [vmem:[#allocation7 + $0x178] sm:$0xf0] }
 0x143   :  { %v1919_v3 = vadd.f32 %v1918_v59, %v1905_v58  ;;  %2540 = vmatpush.bf16.msra.mxu2 %v3843_v18  ;;  %v3871_v58 = vor.u32 %v4238_v56, %v3868_v57  ;;  %2551 = vmatpush.bf16.msra.mxu3 %v3931_v55  ;;  %v4241_v55 = vld [vmem:[#allocation7 + $0x184] sm:$0xf0]  ;;  %v4224_v56 = vld [vmem:[#allocation7 + $0x104] sm:$0xf] }
 0x144   :  { %2569 = vmatpush.bf16.msrb.mxu0 %v3711_v13  ;;  %v3834_v13 = vld [vmem:[#allocation7 + $0x130] sm:$0xf] }
 0x145   :  { %v2103_v4 = vadd.f32 %v2091_v52, %v1919_v3  ;;  %v3835_v24 = vor.u32 %v4231_v28, %v3834_v13  ;;  %2583 = vmatpush.bf16.msrb.mxu1 %v3775_v15  ;;  %v3906_v28 = vld [vmem:[#allocation7 + $0x1c0] sm:$0xf] }
 0x146   :  { %v3907_v15 = vor.u32 %v4249_v14, %v3906_v28  ;;  %v3908_v14 = vld [vmem:[#allocation7 + $0x1c8] sm:$0xf0] }
 0x147   :  { %v2111_v25 = vmax.f32 %v2103_v4, 0.0  ;;  %2541 = vmatpush.bf16.msra.mxu2 %v3835_v24  ;;  %2552 = vmatpush.bf16.msra.mxu3 %v3923_v0  ;;  %v4232_v24 = vld [vmem:[#allocation7 + $0x144] sm:$0xf] }
 0x148   :  { %2570 = vmatpush.bf16.msrb.mxu0 %v3703_v27  ;;  %v3764_v27 = vld [vmem:[#allocation7 + $0xa8] sm:$0xf0]  ;;  %v3847_v20 = vor.u32 %v4232_v24, %v3844_v16 }
 0x149   :  { %v2115_v22 = vpack.c.bf16 %v2111_v25, %v2107_v10  ;;  %v3767_v30 = vor.u32 %v4212_v21, %v3764_v27  ;;  %v3852_v25 = vld [vmem:[#allocation7 + $0x158] sm:$0xf0]  ;;  %v3898_v27 = vld [vmem:[#allocation7 + $0x1b0] sm:$0xf] }
 0x14a   :  { %v3855_v11 = vor.u32 %v4234_v8, %v3852_v25 }
 0x14b   :  { %2517 = vmatmul.bf16.vlgmr.msra.gmra.mxu0 %v2115_v22  ;;  %2542 = vmatpush.bf16.msra.mxu2 %v3827_v26 }
 0x14c   :  { %2571 = vmatpush.bf16.msrb.mxu0 %v3695_v41  ;;  %2584 = vmatpush.bf16.msrb.mxu1 %v3767_v30  ;;  %v4208_v41 = vld [vmem:[#allocation7 + $0x84] sm:$0xf]  ;;  %v4230_v30 = vld [vmem:[#allocation7 + $0x134] sm:$0xf] }
 0x14d   :  { %v3751_v52 = vor.u32 %v4208_v41, %v3748_v45  ;;  %v3839_v33 = vor.u32 %v4230_v30, %v3836_v43  ;;  %v4226_v45 = vld [vmem:[#allocation7 + $0x114] sm:$0xf]  ;;  %v3884_v43 = vld [vmem:[#allocation7 + $0x198] sm:$0xf0] }
 0x14f   :  { %2543 = vmatpush.bf16.msra.mxu2 %v3819_v34  ;;  %v3890_v34 = vld [vmem:[#allocation7 + $0x1a0] sm:$0xf] }
 0x150   :  { %2572 = vmatpush.bf16.msrb.mxu0 %v3687_v60  ;;  %v1930_v29 = vpop.f32.mrf.mxu0  ;;  %2585 = vmatpush.bf16.msrb.mxu1 %v3759_v36  ;;  %v4228_v36 = vld [vmem:[#allocation7 + $0x124] sm:$0xf] }
 0x151   :  { %v1944_v32 = vpop.f32.mrf.mxu1  ;;  %v1931_v38 = vadd.f32 %v1930_v29, %v4507_v5  ;;  %v4247_v29 = vld [vmem:[#allocation7 + $0x1b4] sm:$0xf0]  ;;  %v3831_v40 = vor.u32 %v4228_v36, %v3828_v39  ;;  %v3876_v36 = vld [vmem:[#allocation7 + $0x188] sm:$0xf0] }
 0x152   :  { %v3899_v31 = vor.u32 %v4247_v29, %v3898_v27  ;;  %v4244_v27 = vld [vmem:[#allocation7 + $0x1a4] sm:$0xf]  ;;  %v3892_v29 = vld [vmem:[#allocation7 + $0x1a8] sm:$0xf0] }
 0x153   :  { %v1945_v49 = vadd.f32 %v1944_v32, %v1931_v38  ;;  %2544 = vmatpush.bf16.msra.mxu2 %v3811_v44  ;;  %v3891_v38 = vor.u32 %v4245_v35, %v3890_v34  ;;  %v4243_v44 = vld [vmem:[#allocation7 + $0x194] sm:$0xf0]  ;;  %v4240_v35 = vld [vmem:[#allocation7 + $0x184] sm:$0xf] }
 0x154   :  { %2586 = vmatpush.bf16.msrb.mxu1 %v3751_v52  ;;  %v3874_v52 = vld [vmem:[#allocation7 + $0x180] sm:$0xf] }
 0x155   :  { %v3875_v57 = vor.u32 %v4241_v55, %v3874_v52 }
 0x157   :  { %2593 = vmatpush.bf16.msrb.mxu2 %v3871_v58  ;;  %v3812_v58 = vld [vmem:[#allocation7 + $0x108] sm:$0xf0] }
 0x158   :  { %v1958_v42 = vpop.f32.mrf.mxu2  ;;  %v1932_v50 = vpop.f32.mrf.mxu0  ;;  %v3815_v61 = vor.u32 %v4224_v56, %v3812_v58 }
 0x159   :  { %v1972_v51 = vpop.f32.mrf.mxu3  ;;  %v1959_v59 = vadd.f32 %v1958_v42, %v1945_v49  ;;  %v1933_v5 = vadd.f32 %v1932_v50, %v4509_v54  ;;  %v1946_v60 = vpop.f32.mrf.mxu1  ;;  %v3914_v54 = vld [vmem:[#allocation7 + $0x1d0] sm:$0xf]  ;;  %v3820_v49 = vld [vmem:[#allocation7 + $0x118] sm:$0xf0] }
 0x15a   :  { %v3915_v10 = vor.u32 %v4251_v7, %v3914_v54  ;;  %v3882_v42 = vld [vmem:[#allocation7 + $0x190] sm:$0xf]  ;;  %v3823_v50 = vor.u32 %v4226_v45, %v3820_v49  ;;  %v2093_v7 = vperm.slane %v4535_v37, 2 }
 0x15b   :  { %2573 = vmatmul.bf16.vlgmr.msrb.gmra.mxu0 %v2115_v22  ;;  %v1973_v3 = vadd.f32 %v1972_v51, %v1959_v59  ;;  %v1947_v4 = vadd.f32 %v1946_v60, %v1933_v5  ;;  %2594 = vmatpush.bf16.msrb.mxu2 %v3863_v2  ;;  %v3883_v48 = vor.u32 %v4243_v44, %v3882_v42  ;;  %v4254_v59 = vld [vmem:[#allocation7 + $0x1f4] sm:$0xf]  ;;  %v3932_v5 = vld [vmem:[#allocation7 + $0x1f8] sm:$0xf0] }
 0x15c   :  { %2553 = vmatpush.bf16.msra.mxu3 %v3915_v10  ;;  %v3935_v62 = vor.u32 %v4254_v59, %v3932_v5 }
 0x15d   :  { %v2100_v13 = vadd.f32 %v2092_v23, %v1973_v3  ;;  %v4252_v3 = vld [vmem:[#allocation7 + $0x1e4] sm:$0xf] }
 0x15f   :  { %2595 = vmatpush.bf16.msrb.mxu2 %v3855_v11  ;;  %v2108_v21 = vmax.f32 %v2100_v13, 0.0 }
 0x160   :  { %v1960_v6 = vpop.f32.mrf.mxu2  ;;  %2554 = vmatpush.bf16.msra.mxu3 %v3907_v15 }
 0x161   :  { %v1961_v18 = vadd.f32 %v1960_v6, %v1947_v4  ;;  %v1974_v17 = vpop.f32.mrf.mxu3 }
 0x163   :  { %v1975_v22 = vadd.f32 %v1974_v17, %v1961_v18  ;;  %2596 = vmatpush.bf16.msrb.mxu2 %v3847_v20  ;;  %v4250_v18 = vld [vmem:[#allocation7 + $0x1d4] sm:$0xf]  ;;  %v3916_v17 = vld [vmem:[#allocation7 + $0x1d8] sm:$0xf0] }
 0x164   :  { %2555 = vmatpush.bf16.msra.mxu3 %v3899_v31  ;;  %v3919_v25 = vor.u32 %v4250_v18, %v3916_v17  ;;  %v4246_v20 = vld [vmem:[#allocation7 + $0x1b4] sm:$0xf] }
 0x165   :  { %v2104_v12 = vadd.f32 %v2092_v23, %v1975_v22  ;;  %v3924_v23 = vld [vmem:[#allocation7 + $0x1e8] sm:$0xf0]  ;;  %v4242_v31 = vld [vmem:[#allocation7 + $0x194] sm:$0xf] }
 0x166   :  { %v3927_v6 = vor.u32 %v4252_v3, %v3924_v23  ;;  %v3887_v34 = vor.u32 %v4242_v31, %v3884_v43 }
 0x167   :  { %v2112_v26 = vmax.f32 %v2104_v12, 0.0  ;;  %2597 = vmatpush.bf16.msrb.mxu2 %v3839_v33 }
 0x168   :  { %2556 = vmatpush.bf16.msra.mxu3 %v3891_v38 }
 0x169   :  { %v2116_v32 = vpack.c.bf16 %v2112_v26, %v2108_v21  ;;  %v3900_v21 = vld [vmem:[#allocation7 + $0x1b8] sm:$0xf0] }
 0x16a   :  { %v3903_v26 = vor.u32 %v4246_v20, %v3900_v21 }
 0x16b   :  { %2531 = vmatmul.bf16.vlgmr.msra.gmra.mxu1 %v2116_v32  ;;  %2598 = vmatpush.bf16.msrb.mxu2 %v3831_v40  ;;  %v3879_v40 = vor.u32 %v4240_v35, %v3876_v36 }
 0x16c   :  { %2557 = vmatpush.bf16.msra.mxu3 %v3883_v48 }
 0x16f   :  { %2599 = vmatpush.bf16.msrb.mxu2 %v3823_v50 }
 0x170   :  { %v1986_v41 = vpop.f32.mrf.mxu0  ;;  %2558 = vmatpush.bf16.msra.mxu3 %v3875_v57 }
 0x171   :  { %v2000_v47 = vpop.f32.mrf.mxu1  ;;  %v1987_v51 = vadd.f32 %v1986_v41, %v4515_v9 }
 0x173   :  { %v2001_v63 = vadd.f32 %v2000_v47, %v1987_v51  ;;  %2600 = vmatpush.bf16.msrb.mxu2 %v3815_v61  ;;  %v2094_v51 = vperm.slane %v4535_v37, 3  ;;  %v2183_v37 = vld [vmem:[%s4565_s6] sm:$0x3] }
 0x174   :  { %2607 = vmatpush.bf16.msrb.mxu3 %v3935_v62  ;;  %v2185_v3 = vperm.slane %v2183_v37, 0 }
 0x178   :  { %v2014_v60 = vpop.f32.mrf.mxu2  ;;  %v1988_v0 = vpop.f32.mrf.mxu0  ;;  %2608 = vmatpush.bf16.msrb.mxu3 %v3927_v6  ;;  %v2186_v6 = vperm.slane %v2183_v37, 1 }
 0x179   :  { %v2028_v1 = vpop.f32.mrf.mxu3  ;;  %v2015_v2 = vadd.f32 %v2014_v60, %v2001_v63  ;;  %v1989_v9 = vadd.f32 %v1988_v0, %v4517_v53  ;;  %v2002_v4 = vpop.f32.mrf.mxu1  ;;  %v4248_v53 = vld [vmem:[#allocation7 + $0x1c4] sm:$0xf] }
 0x17a   :  { %v3911_v24 = vor.u32 %v4248_v53, %v3908_v14 }
 0x17b   :  { %2587 = vmatmul.bf16.vlgmr.msrb.gmra.mxu1 %v2116_v32  ;;  %v2029_v54 = vadd.f32 %v2028_v1, %v2015_v2  ;;  %v2003_v8 = vadd.f32 %v2002_v4, %v1989_v9  ;;  %v3895_v32 = vor.u32 %v4244_v27, %v3892_v29 }
 0x17c   :  { %2609 = vmatpush.bf16.msrb.mxu3 %v3919_v25 }
 0x17d   :  { %v2101_v22 = vadd.f32 %v2093_v7, %v2029_v54 }
 0x17f   :  { %v2109_v15 = vmax.f32 %v2101_v22, 0.0  ;;  %v2625_v22 = vld [vmem:[%s4566_s7] sm:$0x3] }
 0x180   :  { %v2016_v10 = vpop.f32.mrf.mxu2  ;;  %2610 = vmatpush.bf16.msrb.mxu3 %v3911_v24  ;;  %v2628_v20 = vperm.slane %v2625_v22, 1 }
 0x181   :  { %v2017_v11 = vadd.f32 %v2016_v10, %v2003_v8  ;;  %v2030_v13 = vpop.f32.mrf.mxu3 }
 0x183   :  { %v2031_v28 = vadd.f32 %v2030_v13, %v2017_v11 }
 0x184   :  { %2611 = vmatpush.bf16.msrb.mxu3 %v3903_v26 }
 0x185   :  { %v2105_v12 = vadd.f32 %v2093_v7, %v2031_v28 }
 0x187   :  { %v2113_v16 = vmax.f32 %v2105_v12, 0.0 }
 0x188   :  { %2612 = vmatpush.bf16.msrb.mxu3 %v3895_v32 }
 0x189   :  { %v2117_v30 = vpack.c.bf16 %v2113_v16, %v2109_v15  ;;  %v2627_v15 = vperm.slane %v2625_v22, 0 }
 0x18b   :  { %2545 = vmatmul.bf16.vlgmr.msra.gmra.mxu2 %v2117_v30 }
 0x18c   :  { %2613 = vmatpush.bf16.msrb.mxu3 %v3887_v34 }
 0x190   :  { %v2042_v33 = vpop.f32.mrf.mxu0  ;;  %2614 = vmatpush.bf16.msrb.mxu3 %v3879_v40 }
 0x191   :  { %v2056_v38 = vpop.f32.mrf.mxu1  ;;  %v2043_v39 = vadd.f32 %v2042_v33, %v4523_v19 }
 0x193   :  { %v2057_v42 = vadd.f32 %v2056_v38, %v2043_v39 }
 0x198   :  { %v2070_v41 = vpop.f32.mrf.mxu2  ;;  %v2044_v45 = vpop.f32.mrf.mxu0 }
 0x199   :  { %v2084_v44 = vpop.f32.mrf.mxu3  ;;  %v2071_v47 = vadd.f32 %v2070_v41, %v2057_v42  ;;  %v2045_v48 = vadd.f32 %v2044_v45, %v4525_v46  ;;  %v2058_v49 = vpop.f32.mrf.mxu1  ;;  %v4263_v45 = vld [vmem:[#allocation2] ss:$0 sm:$0xff] }
 0x19b   :  { %2601 = vmatmul.bf16.vlgmr.msrb.gmra.mxu2 %v2117_v30  ;;  %v2085_v50 = vadd.f32 %v2084_v44, %v2071_v47  ;;  %v2059_v52 = vadd.f32 %v2058_v49, %v2045_v48 }
 0x19d   :  { %v2102_v19 = vadd.f32 %v2094_v51, %v2085_v50 }
 0x19f   :  { %v2110_v5 = vmax.f32 %v2102_v19, 0.0 }
 0x1a0   :  { %v2072_v55 = vpop.f32.mrf.mxu2 }
 0x1a1   :  { %v2073_v56 = vadd.f32 %v2072_v55, %v2059_v52  ;;  %v2086_v57 = vpop.f32.mrf.mxu3 }
 0x1a3   :  { %v2087_v58 = vadd.f32 %v2086_v57, %v2073_v56 }
 0x1a5   :  { %v2106_v59 = vadd.f32 %v2094_v51, %v2087_v58 }
 0x1a7   :  { %v2114_v60 = vmax.f32 %v2106_v59, 0.0 }
 0x1a9   :  { %v2118_v61 = vpack.c.bf16 %v2114_v60, %v2110_v5 }
 0x1ab   :  { %2559 = vmatmul.bf16.vlgmr.msra.gmra.mxu3 %v2118_v61 }
 0x1bb   :  { %2615 = vmatmul.bf16.vlgmr.msrb.gmra.mxu3 %v2118_v61 }
 0x1c8   :  { %v2518_v62 = vpop.f32.mrf.mxu0 }
 0x1c9   :  { %v2519_v4 = vadd.f32 %v2518_v62, %v2185_v3 }
 0x1d0   :  { %v2520_v0 = vpop.f32.mrf.mxu0 }
 0x1d1   :  { %v2521_v13 = vadd.f32 %v2520_v0, %v2185_v3 }
 0x1d8   :  { %v2574_v23 = vpop.f32.mrf.mxu0 }
 0x1d9   :  { %v2575_v17 = vadd.f32 %v2574_v23, %v2186_v6 }
 0x1e0   :  { %v2576_v53 = vpop.f32.mrf.mxu0 }
 0x1e1   :  { %v2577_v26 = vadd.f32 %v2576_v53, %v2186_v6 }
 0x1e8   :  { %v2532_v63 = vpop.f32.mrf.mxu1 }
 0x1e9   :  { %v2533_v8 = vadd.f32 %v2532_v63, %v2519_v4 }
 0x1f0   :  { %v2534_v1 = vpop.f32.mrf.mxu1 }
 0x1f1   :  { %v2535_v14 = vadd.f32 %v2534_v1, %v2521_v13 }
 0x1f8   :  { %v2588_v54 = vpop.f32.mrf.mxu1 }
 0x1f9   :  { %v2589_v25 = vadd.f32 %v2588_v54, %v2575_v17 }
 0x200   :  { %v2590_v21 = vpop.f32.mrf.mxu1 }
 0x201   :  { %v2591_v32 = vadd.f32 %v2590_v21, %v2577_v26 }
 0x20e   :  { %v2546_v46 = vpop.f32.mrf.mxu2 }
 0x20f   :  { %v2547_v10 = vadd.f32 %v2546_v46, %v2533_v8 }
 0x216   :  { %v2548_v2 = vpop.f32.mrf.mxu2 }
 0x217   :  { %v2549_v27 = vadd.f32 %v2548_v2, %v2535_v14 }
 0x21e   :  { %v2602_v18 = vpop.f32.mrf.mxu2 }
 0x21f   :  { %v2603_v28 = vadd.f32 %v2602_v18, %v2589_v25 }
 0x226   :  { %v2604_v30 = vpop.f32.mrf.mxu2 }
 0x227   :  { %v2605_v34 = vadd.f32 %v2604_v30, %v2591_v32 }
 0x22e   :  { %v2560_v9 = vpop.f32.mrf.mxu3 }
 0x22f   :  { %v2561_v11 = vadd.f32 %v2560_v9, %v2547_v10 }
 0x231   :  { %v2621_v12 = vmax.f32 %v2561_v11, 0.0 }
 0x233   :  { %v2631_v43 = vmul.f32 %v2627_v15, %v2621_v12 }
 0x236   :  { %v2562_v7 = vpop.f32.mrf.mxu3 }
 0x237   :  { %v2563_v31 = vadd.f32 %v2562_v7, %v2549_v27 }
 0x239   :  { %v2623_v38 = vmax.f32 %v2563_v31, 0.0 }
 0x23b   :  { %v2633_v41 = vmul.f32 %v2627_v15, %v2623_v38 }
 0x23e   :  { %v2616_v24 = vpop.f32.mrf.mxu3 }
 0x23f   :  { %v2617_v16 = vadd.f32 %v2616_v24, %v2603_v28 }
 0x241   :  { %v2622_v29 = vmax.f32 %v2617_v16, 0.0 }
 0x243   :  { %v2632_v33 = vmul.f32 %v2628_v20, %v2622_v29 }
 0x245   :  { %v2635_v35 = vadd.f32 %v2632_v33, %v2631_v43 }
 0x246   :  { %v2618_v36 = vpop.f32.mrf.mxu3 }
 0x247   :  { %v2619_v39 = vadd.f32 %v2618_v36, %v2605_v34  ;;  %2636 = vadd.xlane.f32.xlu0 %v2635_v35 }
 0x249   :  { %v2624_v40 = vmax.f32 %v2619_v39, 0.0 }
 0x24b   :  { %v2634_v42 = vmul.f32 %v2628_v20, %v2624_v40 }
 0x24d   :  { %v2638_v44 = vadd.f32 %v2634_v42, %v2633_v41 }
 0x24f   :  { %2639 = vadd.xlane.f32.xlu0 %v2638_v44 }
 0x2ba   :  { %v2637_v47 = vpop.xlane.xlu0 %2636 }
 0x2bb   :  { %v2645_v48 = vadd.f32 %v4263_v45, %v2637_v47 }
 0x2bd   :  { %2648 = vst.msk [vmem:[%s4568_s9] sm:$0xff] %vm2647_vm0, %v2645_v48 }
 0x2c2   :  { %v2640_v49 = vpop.xlane.xlu0 %2639 }
 0x2c3   :  { %v2646_v50 = vadd.f32 %v4263_v45, %v2640_v49 }
 0x2c5   :  { %2649 = vst.msk [vmem:[%s4568_s9 + $0x8] sm:$0xff] %vm2647_vm0, %v2646_v50 }
 0x2c6   :  { %2654 = vsyncpa [#allocation4], 1 }
 0x2c7   :  { %2655 = vsyncpa [#allocation6], 1 }

</bundles_post_ra>
